<compile_context>
chip_gen: v7x
topology: tpu7x:2x2x1
jax: 0.10.0
libtpu: 0.0.40
codegen_flags: <defaults>
</compile_context>

<pallas_src>
import numpy as np
import jax
import jax.numpy as jnp
from jax.experimental import pallas as pl
from jax.experimental.pallas import tpu as pltpu


# ----------------------------------------------------------------------------
# host-side helpers (tiny, run once per call)
# ----------------------------------------------------------------------------
def _adaptive_bins(L, p):
    # AdaptiveMaxPool2d bins: [floor(i*L/p), ceil((i+1)*L/p))
    return [((i * L) // p, ((i + 1) * L + p - 1) // p) for i in range(p)]


def _interp_matrix_1d(src, dst):
    # F.interpolate(mode='bilinear', align_corners=True) as a dense (dst, src) matrix.
    M = np.zeros((dst, src), dtype=np.float32)
    if src == 1 or dst == 1:          # dst==1 special-cased (avoids divide-by-zero)
        M[:, 0] = 1.0
        return M
    scale = (src - 1) / (dst - 1)
    for i in range(dst):
        s = i * scale
        i0 = min(int(np.floor(s)), src - 2)
        w = s - i0
        M[i, i0] += 1.0 - w
        M[i, i0 + 1] += w
    return M


def _vmem_limit(estimate_bytes):
    # explicit scoped-VMEM budget: 1.5x headroom, >= 32 MiB, capped at v7x's 64 MiB.
    return int(min(max(int(estimate_bytes * 1.5), 32 * 2 ** 20), 64 * 2 ** 20))


# ----------------------------------------------------------------------------
# Kernel A: adaptive max pools (hierarchical) + channel-stacked 1x1 convs
# output: (N, pp_pad, nb*Cout) bf16  -- the only PPM intermediate that hits HBM
# ----------------------------------------------------------------------------
def _make_pool_conv_kernel(pool_sizes, H, W, C_in, pp, pp_pad):
    p_max = max(pool_sizes)
    hierarchical = all(p_max % p == 0 for p in pool_sizes)   # exact only if bins nest
    bins_hb = _adaptive_bins(H, p_max)
    bins_wb = _adaptive_bins(W, p_max)

    def kernel(x_ref, w_ref, b_ref, mask_ref, o_ref):
        x = x_ref[0]                                          # (H, W, Cin) bf16
        rows = []
        if hierarchical:
            # single row-scan of the image -> p_max x p_max base grid of (1, Cin) maxima
            cells = []
            for (ys, ye) in bins_hb:
                rm = x[ys]
                for r in range(ys + 1, ye):                   # VPU elementwise maxima
                    rm = jnp.maximum(rm, x[r])
                cells.append([jnp.max(rm[xs:xe, :], axis=0, keepdims=True)
                              for (xs, xe) in bins_wb])
            # derive every branch's pooled grid from the base cells (tiny maxima)
            for p in pool_sizes:
                q = p_max // p
                for i in range(p):
                    for j in range(p):
                        v = cells[i * q][j * q]
                        for ii in range(i * q, (i + 1) * q):
                            for jj in range(j * q, (j + 1) * q):
                                if not (ii == i * q and jj == j * q):
                                    v = jnp.maximum(v, cells[ii][jj])
                        rows.append(v)
        else:
            # fallback: direct per-branch scan (exact for arbitrary pool_sizes)
            for p in pool_sizes:
                for (ys, ye) in _adaptive_bins(H, p):
                    rm = x[ys]
                    for r in range(ys + 1, ye):
                        rm = jnp.maximum(rm, x[r])
                    for (xs, xe) in _adaptive_bins(W, p):
                        rows.append(jnp.max(rm[xs:xe, :], axis=0, keepdims=True))
        if pp_pad > pp:
            rows.append(jnp.zeros((pp_pad - pp, C_in), x.dtype))
        pooled = jnp.concatenate(rows, axis=0)                # (pp_pad, Cin)

        # all 1x1 convs as one MXU matmul (bf16 in, f32 acc) + bias, branch-masked.
        conv = jnp.dot(pooled, w_ref[...],
                       preferred_element_type=jnp.float32) + b_ref[...]
        o_ref[0] = (conv * mask_ref[...]).astype(o_ref.dtype)

    return kernel


# ----------------------------------------------------------------------------
# Kernel B: fused (PPM upsample + 3x3 conv over two channel groups + BN partials)
# ----------------------------------------------------------------------------
def _make_conv_stats_kernel(TH, W, C1, C2, C_out, H):
    def kernel(x_blk, x_hbm, cb_ref, m_ref, wa_ref, wb_ref,
               o_ref, ssum_ref, ssq_ref, bufa, bufb, acc_ref, sem):
        # x_blk : (1, TH, W, C2) bf16      auto-pipelined core rows of x
        # x_hbm : (N, H, W, C2)  bf16      full x in HBM (halo rows only)
        # cb_ref: (1, pp_pad, C1) bf16     pooled + 1x1-conv result for this image
        # m_ref : ((TH+2)*W, pp_pad) bf16  bilinear upsample rows for this halo window
        # wa/wb : (9, C1/C2, Cout) bf16    3x3 weights split by channel group
        # o_ref : (1, TH, W, Cout) bf16 ; ssum/ssq: (1,1,1,Cout) f32 BN partials
        # bufa/bufb: VMEM (TH+2, W+2, C1/C2) halo buffers ; acc_ref: VMEM (TH*W, Cout) f32
        n = pl.program_id(0)
        t = pl.program_id(1)
        n_t = pl.num_programs(1)
        r0 = t * TH

        # -- 1. kick off the tiny halo-row DMAs for the x group (top & bottom rows) --
        rtop = jnp.maximum(r0 - 1, 0)
        rbot = jnp.minimum(r0 + TH, H - 1)
        top_cp = pltpu.make_async_copy(
            x_hbm.at[n, pl.ds(rtop, 1)],
            bufb.at[pl.ds(0, 1), pl.ds(1, W)], sem.at[0])
        bot_cp = pltpu.make_async_copy(
            x_hbm.at[n, pl.ds(rbot, 1)],
            bufb.at[pl.ds(TH + 1, 1), pl.ds(1, W)], sem.at[1])

        @pl.when(t > 0)
        def _():
            top_cp.start()

        @pl.when(t < n_t - 1)
        def _():
            bot_cp.start()

        # -- 2. PPM channel group: upsample the pooled result for this halo window ---
        # (rows outside the image were built as zero rows of m_ref -> conv zero-padding)
        up = jnp.dot(m_ref[...], cb_ref[0], preferred_element_type=jnp.float32)
        bufa[:, 1:W + 1, :] = up.reshape(TH + 2, W, C1).astype(jnp.bfloat16)
        zc1 = jnp.zeros((TH + 2, 1, C1), jnp.bfloat16)
        bufa[:, 0:1, :] = zc1                                  # 1-px zero border cols
        bufa[:, W + 1:W + 2, :] = zc1

        # -- 3. x channel group: core rows from the pipelined block + zero borders ---
        bufb[1:TH + 1, 1:W + 1, :] = x_blk[0]
        zc2 = jnp.zeros((TH + 2, 1, C2), jnp.bfloat16)
        bufb[:, 0:1, :] = zc2
        bufb[:, W + 1:W + 2, :] = zc2
        zrow = jnp.zeros((1, W, C2), jnp.bfloat16)

        @pl.when(t == 0)                                       # image top border
        def _():
            bufb[0:1, 1:W + 1, :] = zrow

        @pl.when(t == n_t - 1)                                 # image bottom border
        def _():
            bufb[TH + 1:TH + 2, 1:W + 1, :] = zrow

        @pl.when(t > 0)
        def _():
            top_cp.wait()

        @pl.when(t < n_t - 1)
        def _():
            bot_cp.wait()

        # -- 4. 3x3 conv = 2 groups x 9 shifted-window matmuls into a VMEM f32 acc ---
        acc_ref[...] = jnp.zeros((TH * W, C_out), jnp.float32)
        for buf, w_ref, c_grp in ((bufa, wa_ref, C1), (bufb, wb_ref, C2)):
            # hoist the unaligned kx shifts out of the ky loop (3 slabs, not 9)
            slabs = [buf[:, kx:kx + W, :] for kx in range(3)]  # each (TH+2, W, c_grp)
            for ky in range(3):
                for kx in range(3):
                    win = slabs[kx][ky:ky + TH].reshape(TH * W, c_grp)
                    acc_ref[...] += jnp.dot(win, w_ref[ky * 3 + kx],
                                            preferred_element_type=jnp.float32)

        acc = acc_ref[...]
        o_ref[0] = acc.reshape(TH, W, C_out).astype(o_ref.dtype)
        ssum_ref[0, 0] = jnp.sum(acc, axis=0, keepdims=True)
        ssq_ref[0, 0] = jnp.sum(acc * acc, axis=0, keepdims=True)

    return kernel


# ----------------------------------------------------------------------------
# Kernel C: normalize with global batch stats + affine + ReLU (full-image blocks)
# ----------------------------------------------------------------------------
def _make_bn_relu_kernel(C_out):
    def kernel(conv_ref, scale_ref, shift_ref, o_ref):
        s = scale_ref[...].reshape(1, 1, 1, C_out)
        b = shift_ref[...].reshape(1, 1, 1, C_out)
        y = conv_ref[...].astype(jnp.float32) * s + b
        o_ref[...] = jnp.maximum(y, 0.0).astype(o_ref.dtype)
    return kernel


# ----------------------------------------------------------------------------
# PSPHEAD forward (public wrapper, NCHW in / NCHW out)
# ----------------------------------------------------------------------------
def psp_head_forward(x_nchw, params):
    pool_sizes = params["pool_sizes"]
    nb = len(pool_sizes)
    N, C_in, H, W = x_nchw.shape
    C_out = params["ppm"][0][0].shape[1]
    nb_cout = nb * C_out
    C1, C2 = nb_cout, C_in

    x = jnp.transpose(x_nchw, (0, 2, 3, 1)).astype(jnp.bfloat16)   # NHWC, bf16 operands

    # ---- static host-side constants (tiny) ---------------------------------------
    pps = [p * p for p in pool_sizes]
    pp = int(sum(pps))
    pp_pad = max(8, ((pp + 7) // 8) * 8)
    offs = np.cumsum([0] + pps)

    mask = np.zeros((pp_pad, nb_cout), np.float32)
    M_cat = np.zeros((H * W, pp_pad), np.float32)
    for b, p in enumerate(pool_sizes):
        Mh = _interp_matrix_1d(p, H)
        Mw = _interp_matrix_1d(p, W)
        M_cat[:, offs[b]:offs[b + 1]] = np.einsum(
            'hi,wj->hwij', Mh, Mw).reshape(H * W, p * p)
        mask[offs[b]:offs[b + 1], b * C_out:(b + 1) * C_out] = 1.0

    TH = 8 if (H % 8 == 0 and ((8 + 2) * W) % 8 == 0) else H
    # TODO(synk): for H not a multiple of 8 use a fixed TH with a masked partial last
    # tile instead of falling back to a whole-image tile.
    n_t = H // TH

    # per-tile halo upsample matrices: rows t*TH-1 .. t*TH+TH, zero rows outside image
    M_halo = np.zeros((n_t, (TH + 2) * W, pp_pad), np.float32)
    for t in range(n_t):
        for rr in range(TH + 2):
            r = t * TH - 1 + rr
            if 0 <= r < H:
                M_halo[t, rr * W:(rr + 1) * W, :] = M_cat[r * W:(r + 1) * W, :]
    m_halo = jnp.asarray(M_halo.reshape(n_t * (TH + 2) * W, pp_pad), jnp.bfloat16)

    w_stack = jnp.concatenate([w for (w, _) in params["ppm"]], axis=1).astype(jnp.bfloat16)
    b_stack = jnp.concatenate([b for (_, b) in params["ppm"]], axis=1).astype(jnp.float32)
    mask_j = jnp.asarray(mask)

    # 3x3 conv weights (HWIO) split by concat channel group: [ppm | x]
    # TODO(synk): if deployed with channel counts not multiples of 128, pad C_out /
    # nb_cout to 128 lanes and slice afterwards (avoids masked vst.msk stores).
    wf = params["wf"]
    w9a = wf[:, :, :nb_cout, :].reshape(9, nb_cout, C_out).astype(jnp.bfloat16)
    w9b = wf[:, :, nb_cout:, :].reshape(9, C_in, C_out).astype(jnp.bfloat16)
    # NOTE: the 3x3 conv bias is dropped — it cancels exactly under training-mode BN.

    # ---- Kernel A: pooling + stacked 1x1 convs ------------------------------------
    est_a = (2 * H * W * C_in * 2 + 2 * C_in * nb_cout * 2
             + 4 * pp_pad * nb_cout * 4 + 2 * pp_pad * nb_cout * 2)
    conv_b = pl.pallas_call(
        _make_pool_conv_kernel(pool_sizes, H, W, C_in, pp, pp_pad),
        out_shape=jax.ShapeDtypeStruct((N, pp_pad, nb_cout), jnp.bfloat16),
        grid_spec=pltpu.PrefetchScalarGridSpec(
            num_scalar_prefetch=0,
            grid=(N,),
            in_specs=[
                pl.BlockSpec((1, H, W, C_in), lambda n: (n, 0, 0, 0)),
                pl.BlockSpec((C_in, nb_cout), lambda n: (0, 0)),
                pl.BlockSpec((1, nb_cout), lambda n: (0, 0)),
                pl.BlockSpec((pp_pad, nb_cout), lambda n: (0, 0)),
            ],
            out_specs=pl.BlockSpec((1, pp_pad, nb_cout), lambda n: (n, 0, 0)),
        ),
        compiler_params=pltpu.CompilerParams(
            dimension_semantics=("parallel",),
            vmem_limit_bytes=_vmem_limit(est_a)),
        # TODO(synk): for production (H,W,Cin ~ 64,64,2048) row-tile the pooling with a
        # running-max VMEM scratch so the whole-image block is not required in VMEM.
    )(x, w_stack, b_stack, mask_j)

    # ---- Kernel B: fused upsample + 3x3 conv + BN partials -------------------------
    est_c = (2 * TH * W * C2 * 2 + 2 * (TH + 2) * W * pp_pad * 2
             + 2 * pp_pad * C1 * 2 + 2 * 9 * (C1 + C2) * C_out * 2
             + (TH + 2) * (W + 2) * (C1 + C2) * 2
             + TH * W * C_out * 4 + 2 * TH * W * C_out * 2 + 4 * 2 * C_out * 4)

    def conv_call(single_buffer_weights):
        if single_buffer_weights:
            def w_spec(shp):
                return pl.BlockSpec(shp, lambda n, t: (0, 0, 0),
                                    pipeline_mode=pl.Buffered(1))
        else:
            def w_spec(shp):
                return pl.BlockSpec(shp, lambda n, t: (0, 0, 0))
        return pl.pallas_call(
            _make_conv_stats_kernel(TH, W, C1, C2, C_out, H),
            out_shape=(
                jax.ShapeDtypeStruct((N, H, W, C_out), jnp.bfloat16),
                jax.ShapeDtypeStruct((N, n_t, 1, C_out), jnp.float32),
                jax.ShapeDtypeStruct((N, n_t, 1, C_out), jnp.float32),
            ),
            grid_spec=pltpu.PrefetchScalarGridSpec(
                num_scalar_prefetch=0,
                grid=(N, n_t),
                in_specs=[
                    pl.BlockSpec((1, TH, W, C2), lambda n, t: (n, t, 0, 0)),    # x core rows
                    pl.BlockSpec(memory_space=pl.ANY),                          # x (halo rows)
                    pl.BlockSpec((1, pp_pad, C1), lambda n, t: (n, 0, 0)),      # pooled 1x1 conv
                    pl.BlockSpec(((TH + 2) * W, pp_pad), lambda n, t: (t, 0)),  # upsample rows
                    w_spec((9, C1, C_out)),
                    w_spec((9, C2, C_out)),
                ],
                out_specs=[
                    pl.BlockSpec((1, TH, W, C_out), lambda n, t: (n, t, 0, 0)),
                    pl.BlockSpec((1, 1, 1, C_out), lambda n, t: (n, t, 0, 0)),
                    pl.BlockSpec((1, 1, 1, C_out), lambda n, t: (n, t, 0, 0)),
                ],
                scratch_shapes=[
                    pltpu.VMEM((TH + 2, W + 2, C1), jnp.bfloat16),
                    pltpu.VMEM((TH + 2, W + 2, C2), jnp.bfloat16),
                    pltpu.VMEM((TH * W, C_out), jnp.float32),
                    pltpu.SemaphoreType.DMA((2,)),
                ],
            ),
            compiler_params=pltpu.CompilerParams(
                dimension_semantics=("parallel", "parallel"),
                vmem_limit_bytes=_vmem_limit(est_c)),
        )(x, x, conv_b, m_halo, w9a, w9b)

    try:
        conv, ssum, ssq = conv_call(True)
    except Exception:
        # pipeline_mode=pl.Buffered(1) unsupported on this jax version: fall back to the
        # default (weights double-buffered; costs VMEM headroom only, semantics identical).
        conv, ssum, ssq = conv_call(False)

    # ---- finalize BatchNorm batch statistics (training mode, biased variance) ------
    count = float(N * H * W)
    mean = jnp.sum(ssum, axis=(0, 1, 2)) / count                       # (C_out,)
    var = jnp.maximum(jnp.sum(ssq, axis=(0, 1, 2)) / count - mean * mean, 0.0)
    inv_std = jax.lax.rsqrt(var + 1e-5)
    scale = (params["gamma"][0] * inv_std)                             # (C_out,)
    shift = (params["beta"][0] - mean * scale)
    scale = scale.reshape(1, C_out).astype(jnp.float32)
    shift = shift.reshape(1, C_out).astype(jnp.float32)

    # ---- Kernel C: normalize + affine + ReLU (HBM-bound -> full-image blocks) ------
    est_b = 2 * H * W * C_out * (2 + 4) + 4 * C_out * 4
    out = pl.pallas_call(
        _make_bn_relu_kernel(C_out),
        out_shape=jax.ShapeDtypeStruct((N, H, W, C_out), jnp.float32),
        grid_spec=pltpu.PrefetchScalarGridSpec(
            num_scalar_prefetch=0,
            grid=(N,),
            in_specs=[
                pl.BlockSpec((1, H, W, C_out), lambda n: (n, 0, 0, 0)),
                pl.BlockSpec((1, C_out), lambda n: (0, 0)),
                pl.BlockSpec((1, C_out), lambda n: (0, 0)),
            ],
            out_specs=pl.BlockSpec((1, H, W, C_out), lambda n: (n, 0, 0, 0)),
        ),
        compiler_params=pltpu.CompilerParams(
            dimension_semantics=("parallel",),
            vmem_limit_bytes=_vmem_limit(est_b)),
    )(conv, scale, shift)

    return jnp.transpose(out, (0, 3, 1, 2))                            # NHWC -> NCHW


def init_params(key, in_channels, out_channels, pool_sizes):
    keys = jax.random.split(key, 2 * len(pool_sizes) + 2)
    ppm = []
    for i, _ in enumerate(pool_sizes):
        # torch weight (Cout, Cin, 1, 1) stored here as (Cin, Cout)
        w = 0.1 * jax.random.normal(keys[2 * i], (in_channels, out_channels), jnp.float32)
        b = 0.1 * jax.random.normal(keys[2 * i + 1], (1, out_channels), jnp.float32)
        ppm.append((w, b))
    c_cat = in_channels + len(pool_sizes) * out_channels
    # torch weight (Cout, Ccat, 3, 3) stored here in HWIO: (3, 3, Ccat, Cout)
    wf = 0.1 * jax.random.normal(keys[-2], (3, 3, c_cat, out_channels), jnp.float32)
    # 3x3 conv bias kept for interface parity but unused: it cancels exactly under
    # training-mode BatchNorm (mean subtraction).
    bf = 0.1 * jax.random.normal(keys[-1], (1, out_channels), jnp.float32)
    gamma = jnp.ones((1, out_channels), jnp.float32)     # BatchNorm2d default affine init
    beta = jnp.zeros((1, out_channels), jnp.float32)
    return {"pool_sizes": list(pool_sizes), "ppm": ppm,
            "wf": wf, "bf": bf, "gamma": gamma, "beta": beta}


if __name__ == "__main__":
    key = jax.random.PRNGKey(0)
    kx, kp = jax.random.split(key)
    in_channels, out_channels = 4, 4
    pool_sizes = [1, 2, 3, 6]
    # x matches PyTorch NCHW convention
    x = jax.random.normal(kx, (2, in_channels, 16, 16), jnp.float32)
    params = init_params(kp, in_channels, out_channels, pool_sizes)
    out = psp_head_forward(x, params)
    out = jax.block_until_ready(out)
    assert out.shape == (2, out_channels, 16, 16), out.shape
    print("KERNEL_OK")
</pallas_src>

<mosaic_0001>
module attributes {stable_mosaic.version = 11 : i64} {
  func.func @kernel(%arg0: i32, %arg1: memref<1x16x16x4xbf16, #tpu.memory_space<vmem>>, %arg2: memref<4x16xbf16, #tpu.memory_space<vmem>>, %arg3: memref<1x16xf32, #tpu.memory_space<vmem>>, %arg4: memref<56x16xf32, #tpu.memory_space<vmem>>, %arg5: memref<1x56x16xbf16, #tpu.memory_space<vmem>>) attributes {dimension_semantics = [#tpu.dimension_semantics<parallel>], iteration_bounds = array<i64: 2>, scalar_prefetch = 0 : i64, scratch_operands = 0 : i64, tpu.core_type = #tpu.core_type<tc>, window_params = [{transform_indices = @transform_0, window_bounds = array<i64: 1, 16, 16, 4>}, {pipeline_mode = #tpu.pipeline_mode<synchronous>, transform_indices = @transform_1, window_bounds = array<i64: 4, 16>}, {pipeline_mode = #tpu.pipeline_mode<synchronous>, transform_indices = @transform_2, window_bounds = array<i64: 1, 16>}, {pipeline_mode = #tpu.pipeline_mode<synchronous>, transform_indices = @transform_3, window_bounds = array<i64: 56, 16>}, {transform_indices = @transform_4, window_bounds = array<i64: 1, 56, 16>}]} {
    %c0 = arith.constant 0 : index
    %c0_0 = arith.constant 0 : index
    %c0_1 = arith.constant 0 : index
    %c0_2 = arith.constant 0 : index
    %0 = vector.load %arg1[%c0, %c0_0, %c0_1, %c0_2] : memref<1x16x16x4xbf16, #tpu.memory_space<vmem>>, vector<1x16x16x4xbf16>
    %1 = vector.shape_cast %0 : vector<1x16x16x4xbf16> to vector<16x16x4xbf16>
    %2 = vector.extract_strided_slice %1 {offsets = [0, 0, 0], sizes = [1, 16, 4], strides = [1, 1, 1]} : vector<16x16x4xbf16> to vector<1x16x4xbf16>
    %3 = vector.shape_cast %2 : vector<1x16x4xbf16> to vector<16x4xbf16>
    %4 = vector.extract_strided_slice %1 {offsets = [1, 0, 0], sizes = [1, 16, 4], strides = [1, 1, 1]} : vector<16x16x4xbf16> to vector<1x16x4xbf16>
    %5 = vector.shape_cast %4 : vector<1x16x4xbf16> to vector<16x4xbf16>
    %6 = arith.maximumf %3, %5 : vector<16x4xbf16>
    %7 = vector.extract_strided_slice %1 {offsets = [2, 0, 0], sizes = [1, 16, 4], strides = [1, 1, 1]} : vector<16x16x4xbf16> to vector<1x16x4xbf16>
    %8 = vector.shape_cast %7 : vector<1x16x4xbf16> to vector<16x4xbf16>
    %9 = arith.maximumf %6, %8 : vector<16x4xbf16>
    %10 = vector.extract_strided_slice %9 {offsets = [0, 0], sizes = [3, 4], strides = [1, 1]} : vector<16x4xbf16> to vector<3x4xbf16>
    %cst = arith.constant dense<0xFF80> : vector<4xbf16>
    %11 = vector.multi_reduction <maximumf>, %10, %cst [0] : vector<3x4xbf16> to vector<4xbf16>
    %12 = vector.shape_cast %11 : vector<4xbf16> to vector<1x4xbf16>
    %13 = vector.extract_strided_slice %9 {offsets = [2, 0], sizes = [4, 4], strides = [1, 1]} : vector<16x4xbf16> to vector<4x4xbf16>
    %cst_3 = arith.constant dense<0xFF80> : vector<4xbf16>
    %14 = vector.multi_reduction <maximumf>, %13, %cst_3 [0] : vector<4x4xbf16> to vector<4xbf16>
    %15 = vector.shape_cast %14 : vector<4xbf16> to vector<1x4xbf16>
    %16 = vector.extract_strided_slice %9 {offsets = [5, 0], sizes = [3, 4], strides = [1, 1]} : vector<16x4xbf16> to vector<3x4xbf16>
    %cst_4 = arith.constant dense<0xFF80> : vector<4xbf16>
    %17 = vector.multi_reduction <maximumf>, %16, %cst_4 [0] : vector<3x4xbf16> to vector<4xbf16>
    %18 = vector.shape_cast %17 : vector<4xbf16> to vector<1x4xbf16>
    %19 = vector.extract_strided_slice %9 {offsets = [8, 0], sizes = [3, 4], strides = [1, 1]} : vector<16x4xbf16> to vector<3x4xbf16>
    %cst_5 = arith.constant dense<0xFF80> : vector<4xbf16>
    %20 = vector.multi_reduction <maximumf>, %19, %cst_5 [0] : vector<3x4xbf16> to vector<4xbf16>
    %21 = vector.shape_cast %20 : vector<4xbf16> to vector<1x4xbf16>
    %22 = vector.extract_strided_slice %9 {offsets = [10, 0], sizes = [4, 4], strides = [1, 1]} : vector<16x4xbf16> to vector<4x4xbf16>
    %cst_6 = arith.constant dense<0xFF80> : vector<4xbf16>
    %23 = vector.multi_reduction <maximumf>, %22, %cst_6 [0] : vector<4x4xbf16> to vector<4xbf16>
    %24 = vector.shape_cast %23 : vector<4xbf16> to vector<1x4xbf16>
    %25 = vector.extract_strided_slice %9 {offsets = [13, 0], sizes = [3, 4], strides = [1, 1]} : vector<16x4xbf16> to vector<3x4xbf16>
    %cst_7 = arith.constant dense<0xFF80> : vector<4xbf16>
    %26 = vector.multi_reduction <maximumf>, %25, %cst_7 [0] : vector<3x4xbf16> to vector<4xbf16>
    %27 = vector.shape_cast %26 : vector<4xbf16> to vector<1x4xbf16>
    %28 = vector.extract_strided_slice %1 {offsets = [2, 0, 0], sizes = [1, 16, 4], strides = [1, 1, 1]} : vector<16x16x4xbf16> to vector<1x16x4xbf16>
    %29 = vector.shape_cast %28 : vector<1x16x4xbf16> to vector<16x4xbf16>
    %30 = vector.extract_strided_slice %1 {offsets = [3, 0, 0], sizes = [1, 16, 4], strides = [1, 1, 1]} : vector<16x16x4xbf16> to vector<1x16x4xbf16>
    %31 = vector.shape_cast %30 : vector<1x16x4xbf16> to vector<16x4xbf16>
    %32 = arith.maximumf %29, %31 : vector<16x4xbf16>
    %33 = vector.extract_strided_slice %1 {offsets = [4, 0, 0], sizes = [1, 16, 4], strides = [1, 1, 1]} : vector<16x16x4xbf16> to vector<1x16x4xbf16>
    %34 = vector.shape_cast %33 : vector<1x16x4xbf16> to vector<16x4xbf16>
    %35 = arith.maximumf %32, %34 : vector<16x4xbf16>
    %36 = vector.extract_strided_slice %1 {offsets = [5, 0, 0], sizes = [1, 16, 4], strides = [1, 1, 1]} : vector<16x16x4xbf16> to vector<1x16x4xbf16>
    %37 = vector.shape_cast %36 : vector<1x16x4xbf16> to vector<16x4xbf16>
    %38 = arith.maximumf %35, %37 : vector<16x4xbf16>
    %39 = vector.extract_strided_slice %38 {offsets = [0, 0], sizes = [3, 4], strides = [1, 1]} : vector<16x4xbf16> to vector<3x4xbf16>
    %cst_8 = arith.constant dense<0xFF80> : vector<4xbf16>
    %40 = vector.multi_reduction <maximumf>, %39, %cst_8 [0] : vector<3x4xbf16> to vector<4xbf16>
    %41 = vector.shape_cast %40 : vector<4xbf16> to vector<1x4xbf16>
    %42 = vector.extract_strided_slice %38 {offsets = [2, 0], sizes = [4, 4], strides = [1, 1]} : vector<16x4xbf16> to vector<4x4xbf16>
    %cst_9 = arith.constant dense<0xFF80> : vector<4xbf16>
    %43 = vector.multi_reduction <maximumf>, %42, %cst_9 [0] : vector<4x4xbf16> to vector<4xbf16>
    %44 = vector.shape_cast %43 : vector<4xbf16> to vector<1x4xbf16>
    %45 = vector.extract_strided_slice %38 {offsets = [5, 0], sizes = [3, 4], strides = [1, 1]} : vector<16x4xbf16> to vector<3x4xbf16>
    %cst_10 = arith.constant dense<0xFF80> : vector<4xbf16>
    %46 = vector.multi_reduction <maximumf>, %45, %cst_10 [0] : vector<3x4xbf16> to vector<4xbf16>
    %47 = vector.shape_cast %46 : vector<4xbf16> to vector<1x4xbf16>
    %48 = vector.extract_strided_slice %38 {offsets = [8, 0], sizes = [3, 4], strides = [1, 1]} : vector<16x4xbf16> to vector<3x4xbf16>
    %cst_11 = arith.constant dense<0xFF80> : vector<4xbf16>
    %49 = vector.multi_reduction <maximumf>, %48, %cst_11 [0] : vector<3x4xbf16> to vector<4xbf16>
    %50 = vector.shape_cast %49 : vector<4xbf16> to vector<1x4xbf16>
    %51 = vector.extract_strided_slice %38 {offsets = [10, 0], sizes = [4, 4], strides = [1, 1]} : vector<16x4xbf16> to vector<4x4xbf16>
    %cst_12 = arith.constant dense<0xFF80> : vector<4xbf16>
    %52 = vector.multi_reduction <maximumf>, %51, %cst_12 [0] : vector<4x4xbf16> to vector<4xbf16>
    %53 = vector.shape_cast %52 : vector<4xbf16> to vector<1x4xbf16>
    %54 = vector.extract_strided_slice %38 {offsets = [13, 0], sizes = [3, 4], strides = [1, 1]} : vector<16x4xbf16> to vector<3x4xbf16>
    %cst_13 = arith.constant dense<0xFF80> : vector<4xbf16>
    %55 = vector.multi_reduction <maximumf>, %54, %cst_13 [0] : vector<3x4xbf16> to vector<4xbf16>
    %56 = vector.shape_cast %55 : vector<4xbf16> to vector<1x4xbf16>
    %57 = vector.extract_strided_slice %1 {offsets = [5, 0, 0], sizes = [1, 16, 4], strides = [1, 1, 1]} : vector<16x16x4xbf16> to vector<1x16x4xbf16>
    %58 = vector.shape_cast %57 : vector<1x16x4xbf16> to vector<16x4xbf16>
    %59 = vector.extract_strided_slice %1 {offsets = [6, 0, 0], sizes = [1, 16, 4], strides = [1, 1, 1]} : vector<16x16x4xbf16> to vector<1x16x4xbf16>
    %60 = vector.shape_cast %59 : vector<1x16x4xbf16> to vector<16x4xbf16>
    %61 = arith.maximumf %58, %60 : vector<16x4xbf16>
    %62 = vector.extract_strided_slice %1 {offsets = [7, 0, 0], sizes = [1, 16, 4], strides = [1, 1, 1]} : vector<16x16x4xbf16> to vector<1x16x4xbf16>
    %63 = vector.shape_cast %62 : vector<1x16x4xbf16> to vector<16x4xbf16>
    %64 = arith.maximumf %61, %63 : vector<16x4xbf16>
    %65 = vector.extract_strided_slice %64 {offsets = [0, 0], sizes = [3, 4], strides = [1, 1]} : vector<16x4xbf16> to vector<3x4xbf16>
    %cst_14 = arith.constant dense<0xFF80> : vector<4xbf16>
    %66 = vector.multi_reduction <maximumf>, %65, %cst_14 [0] : vector<3x4xbf16> to vector<4xbf16>
    %67 = vector.shape_cast %66 : vector<4xbf16> to vector<1x4xbf16>
    %68 = vector.extract_strided_slice %64 {offsets = [2, 0], sizes = [4, 4], strides = [1, 1]} : vector<16x4xbf16> to vector<4x4xbf16>
    %cst_15 = arith.constant dense<0xFF80> : vector<4xbf16>
    %69 = vector.multi_reduction <maximumf>, %68, %cst_15 [0] : vector<4x4xbf16> to vector<4xbf16>
    %70 = vector.shape_cast %69 : vector<4xbf16> to vector<1x4xbf16>
    %71 = vector.extract_strided_slice %64 {offsets = [5, 0], sizes = [3, 4], strides = [1, 1]} : vector<16x4xbf16> to vector<3x4xbf16>
    %cst_16 = arith.constant dense<0xFF80> : vector<4xbf16>
    %72 = vector.multi_reduction <maximumf>, %71, %cst_16 [0] : vector<3x4xbf16> to vector<4xbf16>
    %73 = vector.shape_cast %72 : vector<4xbf16> to vector<1x4xbf16>
    %74 = vector.extract_strided_slice %64 {offsets = [8, 0], sizes = [3, 4], strides = [1, 1]} : vector<16x4xbf16> to vector<3x4xbf16>
    %cst_17 = arith.constant dense<0xFF80> : vector<4xbf16>
    %75 = vector.multi_reduction <maximumf>, %74, %cst_17 [0] : vector<3x4xbf16> to vector<4xbf16>
    %76 = vector.shape_cast %75 : vector<4xbf16> to vector<1x4xbf16>
    %77 = vector.extract_strided_slice %64 {offsets = [10, 0], sizes = [4, 4], strides = [1, 1]} : vector<16x4xbf16> to vector<4x4xbf16>
    %cst_18 = arith.constant dense<0xFF80> : vector<4xbf16>
    %78 = vector.multi_reduction <maximumf>, %77, %cst_18 [0] : vector<4x4xbf16> to vector<4xbf16>
    %79 = vector.shape_cast %78 : vector<4xbf16> to vector<1x4xbf16>
    %80 = vector.extract_strided_slice %64 {offsets = [13, 0], sizes = [3, 4], strides = [1, 1]} : vector<16x4xbf16> to vector<3x4xbf16>
    %cst_19 = arith.constant dense<0xFF80> : vector<4xbf16>
    %81 = vector.multi_reduction <maximumf>, %80, %cst_19 [0] : vector<3x4xbf16> to vector<4xbf16>
    %82 = vector.shape_cast %81 : vector<4xbf16> to vector<1x4xbf16>
    %83 = vector.extract_strided_slice %1 {offsets = [8, 0, 0], sizes = [1, 16, 4], strides = [1, 1, 1]} : vector<16x16x4xbf16> to vector<1x16x4xbf16>
    %84 = vector.shape_cast %83 : vector<1x16x4xbf16> to vector<16x4xbf16>
    %85 = vector.extract_strided_slice %1 {offsets = [9, 0, 0], sizes = [1, 16, 4], strides = [1, 1, 1]} : vector<16x16x4xbf16> to vector<1x16x4xbf16>
    %86 = vector.shape_cast %85 : vector<1x16x4xbf16> to vector<16x4xbf16>
    %87 = arith.maximumf %84, %86 : vector<16x4xbf16>
    %88 = vector.extract_strided_slice %1 {offsets = [10, 0, 0], sizes = [1, 16, 4], strides = [1, 1, 1]} : vector<16x16x4xbf16> to vector<1x16x4xbf16>
    %89 = vector.shape_cast %88 : vector<1x16x4xbf16> to vector<16x4xbf16>
    %90 = arith.maximumf %87, %89 : vector<16x4xbf16>
    %91 = vector.extract_strided_slice %90 {offsets = [0, 0], sizes = [3, 4], strides = [1, 1]} : vector<16x4xbf16> to vector<3x4xbf16>
    %cst_20 = arith.constant dense<0xFF80> : vector<4xbf16>
    %92 = vector.multi_reduction <maximumf>, %91, %cst_20 [0] : vector<3x4xbf16> to vector<4xbf16>
    %93 = vector.shape_cast %92 : vector<4xbf16> to vector<1x4xbf16>
    %94 = vector.extract_strided_slice %90 {offsets = [2, 0], sizes = [4, 4], strides = [1, 1]} : vector<16x4xbf16> to vector<4x4xbf16>
    %cst_21 = arith.constant dense<0xFF80> : vector<4xbf16>
    %95 = vector.multi_reduction <maximumf>, %94, %cst_21 [0] : vector<4x4xbf16> to vector<4xbf16>
    %96 = vector.shape_cast %95 : vector<4xbf16> to vector<1x4xbf16>
    %97 = vector.extract_strided_slice %90 {offsets = [5, 0], sizes = [3, 4], strides = [1, 1]} : vector<16x4xbf16> to vector<3x4xbf16>
    %cst_22 = arith.constant dense<0xFF80> : vector<4xbf16>
    %98 = vector.multi_reduction <maximumf>, %97, %cst_22 [0] : vector<3x4xbf16> to vector<4xbf16>
    %99 = vector.shape_cast %98 : vector<4xbf16> to vector<1x4xbf16>
    %100 = vector.extract_strided_slice %90 {offsets = [8, 0], sizes = [3, 4], strides = [1, 1]} : vector<16x4xbf16> to vector<3x4xbf16>
    %cst_23 = arith.constant dense<0xFF80> : vector<4xbf16>
    %101 = vector.multi_reduction <maximumf>, %100, %cst_23 [0] : vector<3x4xbf16> to vector<4xbf16>
    %102 = vector.shape_cast %101 : vector<4xbf16> to vector<1x4xbf16>
    %103 = vector.extract_strided_slice %90 {offsets = [10, 0], sizes = [4, 4], strides = [1, 1]} : vector<16x4xbf16> to vector<4x4xbf16>
    %cst_24 = arith.constant dense<0xFF80> : vector<4xbf16>
    %104 = vector.multi_reduction <maximumf>, %103, %cst_24 [0] : vector<4x4xbf16> to vector<4xbf16>
    %105 = vector.shape_cast %104 : vector<4xbf16> to vector<1x4xbf16>
    %106 = vector.extract_strided_slice %90 {offsets = [13, 0], sizes = [3, 4], strides = [1, 1]} : vector<16x4xbf16> to vector<3x4xbf16>
    %cst_25 = arith.constant dense<0xFF80> : vector<4xbf16>
    %107 = vector.multi_reduction <maximumf>, %106, %cst_25 [0] : vector<3x4xbf16> to vector<4xbf16>
    %108 = vector.shape_cast %107 : vector<4xbf16> to vector<1x4xbf16>
    %109 = vector.extract_strided_slice %1 {offsets = [10, 0, 0], sizes = [1, 16, 4], strides = [1, 1, 1]} : vector<16x16x4xbf16> to vector<1x16x4xbf16>
    %110 = vector.shape_cast %109 : vector<1x16x4xbf16> to vector<16x4xbf16>
    %111 = vector.extract_strided_slice %1 {offsets = [11, 0, 0], sizes = [1, 16, 4], strides = [1, 1, 1]} : vector<16x16x4xbf16> to vector<1x16x4xbf16>
    %112 = vector.shape_cast %111 : vector<1x16x4xbf16> to vector<16x4xbf16>
    %113 = arith.maximumf %110, %112 : vector<16x4xbf16>
    %114 = vector.extract_strided_slice %1 {offsets = [12, 0, 0], sizes = [1, 16, 4], strides = [1, 1, 1]} : vector<16x16x4xbf16> to vector<1x16x4xbf16>
    %115 = vector.shape_cast %114 : vector<1x16x4xbf16> to vector<16x4xbf16>
    %116 = arith.maximumf %113, %115 : vector<16x4xbf16>
    %117 = vector.extract_strided_slice %1 {offsets = [13, 0, 0], sizes = [1, 16, 4], strides = [1, 1, 1]} : vector<16x16x4xbf16> to vector<1x16x4xbf16>
    %118 = vector.shape_cast %117 : vector<1x16x4xbf16> to vector<16x4xbf16>
    %119 = arith.maximumf %116, %118 : vector<16x4xbf16>
    %120 = vector.extract_strided_slice %119 {offsets = [0, 0], sizes = [3, 4], strides = [1, 1]} : vector<16x4xbf16> to vector<3x4xbf16>
    %cst_26 = arith.constant dense<0xFF80> : vector<4xbf16>
    %121 = vector.multi_reduction <maximumf>, %120, %cst_26 [0] : vector<3x4xbf16> to vector<4xbf16>
    %122 = vector.shape_cast %121 : vector<4xbf16> to vector<1x4xbf16>
    %123 = vector.extract_strided_slice %119 {offsets = [2, 0], sizes = [4, 4], strides = [1, 1]} : vector<16x4xbf16> to vector<4x4xbf16>
    %cst_27 = arith.constant dense<0xFF80> : vector<4xbf16>
    %124 = vector.multi_reduction <maximumf>, %123, %cst_27 [0] : vector<4x4xbf16> to vector<4xbf16>
    %125 = vector.shape_cast %124 : vector<4xbf16> to vector<1x4xbf16>
    %126 = vector.extract_strided_slice %119 {offsets = [5, 0], sizes = [3, 4], strides = [1, 1]} : vector<16x4xbf16> to vector<3x4xbf16>
    %cst_28 = arith.constant dense<0xFF80> : vector<4xbf16>
    %127 = vector.multi_reduction <maximumf>, %126, %cst_28 [0] : vector<3x4xbf16> to vector<4xbf16>
    %128 = vector.shape_cast %127 : vector<4xbf16> to vector<1x4xbf16>
    %129 = vector.extract_strided_slice %119 {offsets = [8, 0], sizes = [3, 4], strides = [1, 1]} : vector<16x4xbf16> to vector<3x4xbf16>
    %cst_29 = arith.constant dense<0xFF80> : vector<4xbf16>
    %130 = vector.multi_reduction <maximumf>, %129, %cst_29 [0] : vector<3x4xbf16> to vector<4xbf16>
    %131 = vector.shape_cast %130 : vector<4xbf16> to vector<1x4xbf16>
    %132 = vector.extract_strided_slice %119 {offsets = [10, 0], sizes = [4, 4], strides = [1, 1]} : vector<16x4xbf16> to vector<4x4xbf16>
    %cst_30 = arith.constant dense<0xFF80> : vector<4xbf16>
    %133 = vector.multi_reduction <maximumf>, %132, %cst_30 [0] : vector<4x4xbf16> to vector<4xbf16>
    %134 = vector.shape_cast %133 : vector<4xbf16> to vector<1x4xbf16>
    %135 = vector.extract_strided_slice %119 {offsets = [13, 0], sizes = [3, 4], strides = [1, 1]} : vector<16x4xbf16> to vector<3x4xbf16>
    %cst_31 = arith.constant dense<0xFF80> : vector<4xbf16>
    %136 = vector.multi_reduction <maximumf>, %135, %cst_31 [0] : vector<3x4xbf16> to vector<4xbf16>
    %137 = vector.shape_cast %136 : vector<4xbf16> to vector<1x4xbf16>
    %138 = vector.extract_strided_slice %1 {offsets = [13, 0, 0], sizes = [1, 16, 4], strides = [1, 1, 1]} : vector<16x16x4xbf16> to vector<1x16x4xbf16>
    %139 = vector.shape_cast %138 : vector<1x16x4xbf16> to vector<16x4xbf16>
    %140 = vector.extract_strided_slice %1 {offsets = [14, 0, 0], sizes = [1, 16, 4], strides = [1, 1, 1]} : vector<16x16x4xbf16> to vector<1x16x4xbf16>
    %141 = vector.shape_cast %140 : vector<1x16x4xbf16> to vector<16x4xbf16>
    %142 = arith.maximumf %139, %141 : vector<16x4xbf16>
    %143 = vector.extract_strided_slice %1 {offsets = [15, 0, 0], sizes = [1, 16, 4], strides = [1, 1, 1]} : vector<16x16x4xbf16> to vector<1x16x4xbf16>
    %144 = vector.shape_cast %143 : vector<1x16x4xbf16> to vector<16x4xbf16>
    %145 = arith.maximumf %142, %144 : vector<16x4xbf16>
    %146 = vector.extract_strided_slice %145 {offsets = [0, 0], sizes = [3, 4], strides = [1, 1]} : vector<16x4xbf16> to vector<3x4xbf16>
    %cst_32 = arith.constant dense<0xFF80> : vector<4xbf16>
    %147 = vector.multi_reduction <maximumf>, %146, %cst_32 [0] : vector<3x4xbf16> to vector<4xbf16>
    %148 = vector.shape_cast %147 : vector<4xbf16> to vector<1x4xbf16>
    %149 = vector.extract_strided_slice %145 {offsets = [2, 0], sizes = [4, 4], strides = [1, 1]} : vector<16x4xbf16> to vector<4x4xbf16>
    %cst_33 = arith.constant dense<0xFF80> : vector<4xbf16>
    %150 = vector.multi_reduction <maximumf>, %149, %cst_33 [0] : vector<4x4xbf16> to vector<4xbf16>
    %151 = vector.shape_cast %150 : vector<4xbf16> to vector<1x4xbf16>
    %152 = vector.extract_strided_slice %145 {offsets = [5, 0], sizes = [3, 4], strides = [1, 1]} : vector<16x4xbf16> to vector<3x4xbf16>
    %cst_34 = arith.constant dense<0xFF80> : vector<4xbf16>
    %153 = vector.multi_reduction <maximumf>, %152, %cst_34 [0] : vector<3x4xbf16> to vector<4xbf16>
    %154 = vector.shape_cast %153 : vector<4xbf16> to vector<1x4xbf16>
    %155 = vector.extract_strided_slice %145 {offsets = [8, 0], sizes = [3, 4], strides = [1, 1]} : vector<16x4xbf16> to vector<3x4xbf16>
    %cst_35 = arith.constant dense<0xFF80> : vector<4xbf16>
    %156 = vector.multi_reduction <maximumf>, %155, %cst_35 [0] : vector<3x4xbf16> to vector<4xbf16>
    %157 = vector.shape_cast %156 : vector<4xbf16> to vector<1x4xbf16>
    %158 = vector.extract_strided_slice %145 {offsets = [10, 0], sizes = [4, 4], strides = [1, 1]} : vector<16x4xbf16> to vector<4x4xbf16>
    %cst_36 = arith.constant dense<0xFF80> : vector<4xbf16>
    %159 = vector.multi_reduction <maximumf>, %158, %cst_36 [0] : vector<4x4xbf16> to vector<4xbf16>
    %160 = vector.shape_cast %159 : vector<4xbf16> to vector<1x4xbf16>
    %161 = vector.extract_strided_slice %145 {offsets = [13, 0], sizes = [3, 4], strides = [1, 1]} : vector<16x4xbf16> to vector<3x4xbf16>
    %cst_37 = arith.constant dense<0xFF80> : vector<4xbf16>
    %162 = vector.multi_reduction <maximumf>, %161, %cst_37 [0] : vector<3x4xbf16> to vector<4xbf16>
    %163 = vector.shape_cast %162 : vector<4xbf16> to vector<1x4xbf16>
    %164 = arith.maximumf %12, %15 : vector<1x4xbf16>
    %165 = arith.maximumf %164, %18 : vector<1x4xbf16>
    %166 = arith.maximumf %165, %21 : vector<1x4xbf16>
    %167 = arith.maximumf %166, %24 : vector<1x4xbf16>
    %168 = arith.maximumf %167, %27 : vector<1x4xbf16>
    %169 = arith.maximumf %168, %41 : vector<1x4xbf16>
    %170 = arith.maximumf %169, %44 : vector<1x4xbf16>
    %171 = arith.maximumf %170, %47 : vector<1x4xbf16>
    %172 = arith.maximumf %171, %50 : vector<1x4xbf16>
    %173 = arith.maximumf %172, %53 : vector<1x4xbf16>
    %174 = arith.maximumf %173, %56 : vector<1x4xbf16>
    %175 = arith.maximumf %174, %67 : vector<1x4xbf16>
    %176 = arith.maximumf %175, %70 : vector<1x4xbf16>
    %177 = arith.maximumf %176, %73 : vector<1x4xbf16>
    %178 = arith.maximumf %177, %76 : vector<1x4xbf16>
    %179 = arith.maximumf %178, %79 : vector<1x4xbf16>
    %180 = arith.maximumf %179, %82 : vector<1x4xbf16>
    %181 = arith.maximumf %180, %93 : vector<1x4xbf16>
    %182 = arith.maximumf %181, %96 : vector<1x4xbf16>
    %183 = arith.maximumf %182, %99 : vector<1x4xbf16>
    %184 = arith.maximumf %183, %102 : vector<1x4xbf16>
    %185 = arith.maximumf %184, %105 : vector<1x4xbf16>
    %186 = arith.maximumf %185, %108 : vector<1x4xbf16>
    %187 = arith.maximumf %186, %122 : vector<1x4xbf16>
    %188 = arith.maximumf %187, %125 : vector<1x4xbf16>
    %189 = arith.maximumf %188, %128 : vector<1x4xbf16>
    %190 = arith.maximumf %189, %131 : vector<1x4xbf16>
    %191 = arith.maximumf %190, %134 : vector<1x4xbf16>
    %192 = arith.maximumf %191, %137 : vector<1x4xbf16>
    %193 = arith.maximumf %192, %148 : vector<1x4xbf16>
    %194 = arith.maximumf %193, %151 : vector<1x4xbf16>
    %195 = arith.maximumf %194, %154 : vector<1x4xbf16>
    %196 = arith.maximumf %195, %157 : vector<1x4xbf16>
    %197 = arith.maximumf %196, %160 : vector<1x4xbf16>
    %198 = arith.maximumf %197, %163 : vector<1x4xbf16>
    %199 = arith.maximumf %12, %15 : vector<1x4xbf16>
    %200 = arith.maximumf %199, %18 : vector<1x4xbf16>
    %201 = arith.maximumf %200, %41 : vector<1x4xbf16>
    %202 = arith.maximumf %201, %44 : vector<1x4xbf16>
    %203 = arith.maximumf %202, %47 : vector<1x4xbf16>
    %204 = arith.maximumf %203, %67 : vector<1x4xbf16>
    %205 = arith.maximumf %204, %70 : vector<1x4xbf16>
    %206 = arith.maximumf %205, %73 : vector<1x4xbf16>
    %207 = arith.maximumf %21, %24 : vector<1x4xbf16>
    %208 = arith.maximumf %207, %27 : vector<1x4xbf16>
    %209 = arith.maximumf %208, %50 : vector<1x4xbf16>
    %210 = arith.maximumf %209, %53 : vector<1x4xbf16>
    %211 = arith.maximumf %210, %56 : vector<1x4xbf16>
    %212 = arith.maximumf %211, %76 : vector<1x4xbf16>
    %213 = arith.maximumf %212, %79 : vector<1x4xbf16>
    %214 = arith.maximumf %213, %82 : vector<1x4xbf16>
    %215 = arith.maximumf %93, %96 : vector<1x4xbf16>
    %216 = arith.maximumf %215, %99 : vector<1x4xbf16>
    %217 = arith.maximumf %216, %122 : vector<1x4xbf16>
    %218 = arith.maximumf %217, %125 : vector<1x4xbf16>
    %219 = arith.maximumf %218, %128 : vector<1x4xbf16>
    %220 = arith.maximumf %219, %148 : vector<1x4xbf16>
    %221 = arith.maximumf %220, %151 : vector<1x4xbf16>
    %222 = arith.maximumf %221, %154 : vector<1x4xbf16>
    %223 = arith.maximumf %102, %105 : vector<1x4xbf16>
    %224 = arith.maximumf %223, %108 : vector<1x4xbf16>
    %225 = arith.maximumf %224, %131 : vector<1x4xbf16>
    %226 = arith.maximumf %225, %134 : vector<1x4xbf16>
    %227 = arith.maximumf %226, %137 : vector<1x4xbf16>
    %228 = arith.maximumf %227, %157 : vector<1x4xbf16>
    %229 = arith.maximumf %228, %160 : vector<1x4xbf16>
    %230 = arith.maximumf %229, %163 : vector<1x4xbf16>
    %231 = arith.maximumf %12, %15 : vector<1x4xbf16>
    %232 = arith.maximumf %231, %41 : vector<1x4xbf16>
    %233 = arith.maximumf %232, %44 : vector<1x4xbf16>
    %234 = arith.maximumf %18, %21 : vector<1x4xbf16>
    %235 = arith.maximumf %234, %47 : vector<1x4xbf16>
    %236 = arith.maximumf %235, %50 : vector<1x4xbf16>
    %237 = arith.maximumf %24, %27 : vector<1x4xbf16>
    %238 = arith.maximumf %237, %53 : vector<1x4xbf16>
    %239 = arith.maximumf %238, %56 : vector<1x4xbf16>
    %240 = arith.maximumf %67, %70 : vector<1x4xbf16>
    %241 = arith.maximumf %240, %93 : vector<1x4xbf16>
    %242 = arith.maximumf %241, %96 : vector<1x4xbf16>
    %243 = arith.maximumf %73, %76 : vector<1x4xbf16>
    %244 = arith.maximumf %243, %99 : vector<1x4xbf16>
    %245 = arith.maximumf %244, %102 : vector<1x4xbf16>
    %246 = arith.maximumf %79, %82 : vector<1x4xbf16>
    %247 = arith.maximumf %246, %105 : vector<1x4xbf16>
    %248 = arith.maximumf %247, %108 : vector<1x4xbf16>
    %249 = arith.maximumf %122, %125 : vector<1x4xbf16>
    %250 = arith.maximumf %249, %148 : vector<1x4xbf16>
    %251 = arith.maximumf %250, %151 : vector<1x4xbf16>
    %252 = arith.maximumf %128, %131 : vector<1x4xbf16>
    %253 = arith.maximumf %252, %154 : vector<1x4xbf16>
    %254 = arith.maximumf %253, %157 : vector<1x4xbf16>
    %255 = arith.maximumf %134, %137 : vector<1x4xbf16>
    %256 = arith.maximumf %255, %160 : vector<1x4xbf16>
    %257 = arith.maximumf %256, %163 : vector<1x4xbf16>
    %cst_38 = arith.constant 0.000000e+00 : bf16
    %258 = vector.broadcast %cst_38 : bf16 to vector<6x4xbf16>
    %259 = tpu.concatenate %198, %206, %214, %222, %230, %233, %236, %239, %242, %245, %248, %251, %254, %257, %12, %15 in 0 : vector<1x4xbf16>, vector<1x4xbf16>, vector<1x4xbf16>, vector<1x4xbf16>, vector<1x4xbf16>, vector<1x4xbf16>, vector<1x4xbf16>, vector<1x4xbf16>, vector<1x4xbf16>, vector<1x4xbf16>, vector<1x4xbf16>, vector<1x4xbf16>, vector<1x4xbf16>, vector<1x4xbf16>, vector<1x4xbf16>, vector<1x4xbf16> -> vector<16x4xbf16>
    %260 = tpu.concatenate %18, %21, %24, %27, %41, %44, %47, %50, %53, %56, %67, %70, %73, %76, %79, %82 in 0 : vector<1x4xbf16>, vector<1x4xbf16>, vector<1x4xbf16>, vector<1x4xbf16>, vector<1x4xbf16>, vector<1x4xbf16>, vector<1x4xbf16>, vector<1x4xbf16>, vector<1x4xbf16>, vector<1x4xbf16>, vector<1x4xbf16>, vector<1x4xbf16>, vector<1x4xbf16>, vector<1x4xbf16>, vector<1x4xbf16>, vector<1x4xbf16> -> vector<16x4xbf16>
    %261 = tpu.concatenate %93, %96, %99, %102, %105, %108, %122, %125, %128, %131, %134, %137, %148, %151, %154, %157 in 0 : vector<1x4xbf16>, vector<1x4xbf16>, vector<1x4xbf16>, vector<1x4xbf16>, vector<1x4xbf16>, vector<1x4xbf16>, vector<1x4xbf16>, vector<1x4xbf16>, vector<1x4xbf16>, vector<1x4xbf16>, vector<1x4xbf16>, vector<1x4xbf16>, vector<1x4xbf16>, vector<1x4xbf16>, vector<1x4xbf16>, vector<1x4xbf16> -> vector<16x4xbf16>
    %262 = tpu.concatenate %160, %163, %258 in 0 : vector<1x4xbf16>, vector<1x4xbf16>, vector<6x4xbf16> -> vector<8x4xbf16>
    %263 = tpu.concatenate %259, %260, %261, %262 in 0 : vector<16x4xbf16>, vector<16x4xbf16>, vector<16x4xbf16>, vector<8x4xbf16> -> vector<56x4xbf16>
    %c0_39 = arith.constant 0 : index
    %c0_40 = arith.constant 0 : index
    %264 = vector.load %arg2[%c0_39, %c0_40] : memref<4x16xbf16, #tpu.memory_space<vmem>>, vector<4x16xbf16>
    %cst_41 = arith.constant dense<0.000000e+00> : vector<56x16xf32>
    %265 = tpu.matmul %263, %264, %cst_41 {dimension_numbers = #tpu.dot_dimension_numbers<[1], [0], [0], [1], [0, 0, 1, 1], [], []>} : vector<56x4xbf16>, vector<4x16xbf16>, vector<56x16xf32> -> vector<56x16xf32>
    %c0_42 = arith.constant 0 : index
    %c0_43 = arith.constant 0 : index
    %266 = vector.load %arg3[%c0_42, %c0_43] : memref<1x16xf32, #tpu.memory_space<vmem>>, vector<1x16xf32>
    %267 = vector.broadcast %266 : vector<1x16xf32> to vector<56x16xf32>
    %268 = arith.addf %265, %267 : vector<56x16xf32>
    %c0_44 = arith.constant 0 : index
    %c0_45 = arith.constant 0 : index
    %269 = vector.load %arg4[%c0_44, %c0_45] : memref<56x16xf32, #tpu.memory_space<vmem>>, vector<56x16xf32>
    %270 = arith.mulf %268, %269 : vector<56x16xf32>
    %271 = arith.truncf %270 : vector<56x16xf32> to vector<56x16xbf16>
    %c0_46 = arith.constant 0 : index
    %c0_47 = arith.constant 0 : index
    %c0_48 = arith.constant 0 : index
    %272 = vector.load %arg5[%c0_46, %c0_47, %c0_48] : memref<1x56x16xbf16, #tpu.memory_space<vmem>>, vector<1x56x16xbf16>
    %273 = vector.shape_cast %272 : vector<1x56x16xbf16> to vector<56x16xbf16>
    %274 = vector.shape_cast %271 : vector<56x16xbf16> to vector<1x56x16xbf16>
    tpu.vector_store %arg5[%c0_46, %c0_47, %c0_48], %274 {strides = array<i32>} : memref<1x56x16xbf16, #tpu.memory_space<vmem>>, vector<1x56x16xbf16>,
    return
  }
  func.func @transform_0(%arg0: i32) -> (i32, i32, i32, i32) {
    %c0_i32 = arith.constant 0 : i32
    %c0_i32_0 = arith.constant 0 : i32
    %c0_i32_1 = arith.constant 0 : i32
    %c0_i32_2 = arith.constant 0 : i32
    return %arg0, %c0_i32, %c0_i32_0, %c0_i32_1 : i32, i32, i32, i32
  }
  func.func @transform_1(%arg0: i32) -> (i32, i32) {
    %c0_i32 = arith.constant 0 : i32
    %c0_i32_0 = arith.constant 0 : i32
    %c0_i32_1 = arith.constant 0 : i32
    return %c0_i32, %c0_i32_0 : i32, i32
  }
  func.func @transform_2(%arg0: i32) -> (i32, i32) {
    %c0_i32 = arith.constant 0 : i32
    %c0_i32_0 = arith.constant 0 : i32
    %c0_i32_1 = arith.constant 0 : i32
    return %c0_i32, %c0_i32_0 : i32, i32
  }
  func.func @transform_3(%arg0: i32) -> (i32, i32) {
    %c0_i32 = arith.constant 0 : i32
    %c0_i32_0 = arith.constant 0 : i32
    %c0_i32_1 = arith.constant 0 : i32
    return %c0_i32, %c0_i32_0 : i32, i32
  }
  func.func @transform_4(%arg0: i32) -> (i32, i32, i32) {
    %c0_i32 = arith.constant 0 : i32
    %c0_i32_0 = arith.constant 0 : i32
    %c0_i32_1 = arith.constant 0 : i32
    return %arg0, %c0_i32, %c0_i32_0 : i32, i32, i32
  }
}

</mosaic_0001>

<bundles_post_ra>
// kernel: tpu_custom_call.1
= control target key start
LH: loop header
LB: loop body
LE: loop exit
PB: predicated region body
PF: predicated region fallthrough
CT: control target
= control target key end

     0   :  { %s1205_s15 = smov 0   ;;  %s1783_s0 = inlined_call_operand.vmem [shape: bf16[2,16,16,4], index: 0, kind: input, shape index: {}]   ;;  %s1784_s1 = inlined_call_operand.vmem [shape: bf16[4,16], index: 1, kind: input, shape index: {}]   ;;  %s1785_s2 = inlined_call_operand.vmem [shape: f32[1,16], index: 2, kind: input, shape index: {}]   ;;  %s1786_s3 = inlined_call_operand.vmem [shape: f32[56,16], index: 3, kind: input, shape index: {}]   ;;  %s1787_s4 = inlined_call_operand.vmem [shape: bf16[2,56,16], index: 4, kind: output, shape index: {}]  }
   0x1 LB: > { %s1114_s16 = sadd.s32 4294967295, %s1178_s15   ;;  %p1118_p0 = scmp.ge.s32.totalorder %s1178_s15, 1  ;;  %s1178_s15 = sphi %s1205_s15, %s14_s15  }
   0x2   : > { %p162_p1 = scmp.lt.s32.totalorder %s1178_s15, 3 }
   0x4   : > { %p163_p2 = pnand %p1118_p0, %p162_p1 }
   0x6   : > { %166 = sbr.rel (%p163_p2) target bundleno = 396 (0x18c), region = 36 }
   0xd   : > { %p188_p3 = scmp.lt.s32.totalorder %s1114_s16, 1  ;;  %vm236_vm0 = vcmask 25600   ;;  %vm237_vm1 = vsmask.f32 1280  ;;  %vm265_vm2 = vcmask 27650   ;;  %vm1788_vm4 = vcmask 1041408  }
   0xe   : > { %vm266_vm3 = vsmask.f32 7946  ;;  %v921_v0 = vld [vmem:[%s1784_s1] sm:$0x3]  ;;  %vm1223_vm5 = vmand %vm236_vm0, %vm237_vm1  ;;  %vm1790_vm6 = vcmask 26625   ;;  %vm1789_vm8 = vcmask 1040384  }
   0xf   : > { %s1846_s16 = smov (!%p188_p3, %s1114_s16), 1  ;;  %1162 = vmatprep.subr.msk.bf16.mxu1 %vm1788_vm4, %v921_v0  ;;  %v942_v1 = vsel %vm1788_vm4, %v921_v0, 0  ;;  %1161 = vmatprep.subr.msk.bf16.mxu0 %vm1788_vm4, %v921_v0  ;;  %vm1232_vm7 = vmand %vm265_vm2, %vm266_vm3  ;;  %vm780_vm9 = vsmask.f32 256  ;;  %vm1791_vm12 = vcmask 1042432   ;;  %vm805_vm14 = vcmask 1043456  }
  0x10   : > { %s1136_s19 = sshll.u32 %s1846_s16, 7  ;;  %1160 = vmatpush3.bf16.msra.mxu1 %v942_v1  ;;  %1150 = vmatpush3.bf16.msra.mxu0 %v942_v1  ;;  %vm1271_vm10 = vmand %vm1789_vm8, %vm780_vm9  ;;  %vm797_vm13 = vsmask.f32 2304  ;;  %vm806_vm15 = vsmask.f32 3328  ;;  %vm814_vm0 = vcmask 1044480  }
  0x11   : > { %s1230_s22 = scalar_lea.vmem %s1783_s0, %s1136_s19  ;;  %vm1287_vm11 = vmand %vm1788_vm4, %vm237_vm1  ;;  %vm815_vm1 = vsmask.f32 4352  ;;  %vm1792_vm2 = vcmask 1045504   ;;  %vm824_vm9 = vsmask.f32 5376  ;;  %s1163_s25 = smul.u32 28, %s1846_s16 }
  0x12   : > { %v216_v4 = vld [vmem:[%s1230_s22 + $0x40] sm:$0xf]  ;;  %v217_v5 = vld [vmem:[%s1230_s22 + $0x44] sm:$0xf]  ;;  %v218_v6 = vld [vmem:[%s1230_s22 + $0x48] sm:$0xf] }
  0x13   : > { %v219_v7 = vld [vmem:[%s1230_s22 + $0x4c] sm:$0xf]  ;;  %v220_v8 = vld [vmem:[%s1230_s22 + $0x50] sm:$0xf]  ;;  %v221_v9 = vld [vmem:[%s1230_s22 + $0x54] sm:$0xf]  ;;  %v464_v10 = vmax.bf16 %v218_v6, %v216_v4  ;;  %s1752_s8 = scalar_lea.vmem %s1787_s4, %s1163_s25 }
  0x14   : > { %v465_v11 = vmax.bf16 %v219_v7, %v217_v5  ;;  %v222_v12 = vld [vmem:[%s1230_s22 + $0x58] sm:$0xf]  ;;  %v223_v13 = vld [vmem:[%s1230_s22 + $0x5c] sm:$0xf]  ;;  %v224_v14 = vld [vmem:[%s1230_s22 + $0x60] sm:$0xf] }
  0x15   : > { %v466_v15 = vmax.bf16 %v464_v10, %v220_v8  ;;  %v538_v16 = vmax.bf16 %v222_v12, %v220_v8  ;;  %v539_v18 = vmax.bf16 %v223_v13, %v221_v9  ;;  %v225_v35 = vld [vmem:[%s1230_s22 + $0x64] sm:$0xf]  ;;  %v1255_v39 = vld [vmem:[%s1230_s22 + $0x68] sm:$0xf]  ;;  %v1260_v44 = vld [vmem:[%s1230_s22 + $0x6c] sm:$0xf] }
  0x16   : > { %v467_v17 = vmax.bf16 %v465_v11, %v221_v9  ;;  %vm1363_vm3 = vmand %vm1791_vm12, %vm797_vm13  ;;  %vm832_vm13 = vcmask 1046528  }
  0x17   : > { %v468_v19 = vsel %vm1223_vm5, %v466_v15, 4286644096  ;;  %v480_v20 = vsel %vm1790_vm6, %v466_v15, 4286644096  ;;  %v492_v21 = vsel %vm1232_vm7, %v466_v15, 4286644096  ;;  %v540_v22 = vmax.bf16 %v538_v16, %v224_v14 }
  0x18   : > { %v469_v23 = vunpack.i.l.bf16 %v468_v19  ;;  %v470_v24 = vunpack.i.h.bf16 %v468_v19  ;;  %v482_v25 = vunpack.i.l.bf16 %v480_v20  ;;  %v483_v26 = vunpack.i.h.bf16 %v480_v20 }
  0x19   : > { %v493_v27 = vunpack.i.l.bf16 %v492_v21  ;;  %v494_v28 = vunpack.i.h.bf16 %v492_v21  ;;  %v503_v29 = vsel %vm1223_vm5, %v467_v17, 4286644096  ;;  %v515_v30 = vsel %vm1790_vm6, %v467_v17, 4286644096 }
  0x1a   : > { %v471_v31 = vmax.f32 %v469_v23, %v470_v24  ;;  %v484_v32 = vmax.f32 %v482_v25, %v483_v26  ;;  %v504_v33 = vunpack.i.l.bf16 %v503_v29  ;;  %v505_v34 = vunpack.i.h.bf16 %v503_v29 }
  0x1b   : > { %v495_v36 = vmax.f32 %v493_v27, %v494_v28  ;;  %v517_v37 = vunpack.i.l.bf16 %v515_v30  ;;  %v518_v38 = vunpack.i.h.bf16 %v515_v30  ;;  %v527_v40 = vsel %vm1232_vm7, %v467_v17, 4286644096 }
  0x1c   : > { %v472_v41 = vrot.slane %v471_v31, 4  ;;  %v485_v42 = vrot.slane %v484_v32, 4  ;;  %v506_v43 = vmax.f32 %v504_v33, %v505_v34  ;;  %v528_v45 = vunpack.i.l.bf16 %v527_v40 }
  0x1d   : > { %v496_v46 = vrot.slane %v495_v36, 4  ;;  %v519_v47 = vmax.f32 %v517_v37, %v518_v38  ;;  %v529_v48 = vunpack.i.h.bf16 %v527_v40  ;;  %v541_v49 = vmax.bf16 %v539_v18, %v225_v35 }
  0x1e   : > { %v473_v50 = vmax.f32 %v471_v31, %v472_v41  ;;  %v486_v51 = vmax.f32 %v484_v32, %v485_v42  ;;  %v507_v52 = vrot.slane %v506_v43, 4  ;;  %v542_v53 = vmax.bf16 %v540_v22, %v1255_v39 }
  0x1f   : > { %v497_v54 = vmax.f32 %v495_v36, %v496_v46  ;;  %v520_v55 = vrot.slane %v519_v47, 4  ;;  %v530_v56 = vmax.f32 %v528_v45, %v529_v48  ;;  %v1264_v57 = vmax.bf16 %v541_v49, %v1260_v44 }
  0x20   : > { %v474_v58 = vrot.slane %v473_v50, 2  ;;  %v487_v59 = vrot.slane %v486_v51, 2  ;;  %v508_v60 = vmax.f32 %v506_v43, %v507_v52  ;;  %v544_v61 = vsel %vm1223_vm5, %v542_v53, 4286644096 }
  0x21   : > { %v498_v62 = vrot.slane %v497_v54, 2  ;;  %v521_v63 = vmax.f32 %v519_v47, %v520_v55  ;;  %v531_v0 = vrot.slane %v530_v56, 4  ;;  %v545_v1 = vunpack.i.l.bf16 %v544_v61 }
  0x22   : > { %v475_v4 = vmax.f32 %v473_v50, %v474_v58  ;;  %v488_v5 = vmax.f32 %v486_v51, %v487_v59  ;;  %v509_v6 = vrot.slane %v508_v60, 2  ;;  %v546_v7 = vunpack.i.h.bf16 %v544_v61 }
  0x23   : > { %v499_v8 = vmax.f32 %v497_v54, %v498_v62  ;;  %v522_v9 = vrot.slane %v521_v63, 2  ;;  %v532_v10 = vmax.f32 %v530_v56, %v531_v0  ;;  %v556_v11 = vsel %vm1790_vm6, %v542_v53, 4286644096 }
  0x24   : > { %v476_v12 = vrot.slane %v475_v4, 1  ;;  %v489_v13 = vrot.slane %v488_v5, 1  ;;  %v510_v14 = vmax.f32 %v508_v60, %v509_v6  ;;  %v547_v15 = vmax.f32 %v545_v1, %v546_v7  ;;  %v228_v6 = vld [vmem:[%s1230_s22 + $0x70] sm:$0xf]  ;;  %v229_v7 = vld [vmem:[%s1230_s22 + $0x74] sm:$0xf] }
  0x25   : > { %v500_v16 = vrot.slane %v499_v8, 1  ;;  %v523_v17 = vmax.f32 %v521_v63, %v522_v9  ;;  %v533_v18 = vrot.slane %v532_v10, 2  ;;  %v558_v19 = vunpack.i.l.bf16 %v556_v11 }
  0x26   : > { %v477_v20 = vmax.f32 %v475_v4, %v476_v12  ;;  %v490_v21 = vmax.f32 %v488_v5, %v489_v13  ;;  %v511_v22 = vrot.slane %v510_v14, 1  ;;  %v548_v23 = vrot.slane %v547_v15, 4 }
  0x27   : > { %v501_v24 = vmax.f32 %v499_v8, %v500_v16  ;;  %v524_v25 = vrot.slane %v523_v17, 1  ;;  %v534_v27 = vmax.f32 %v532_v10, %v533_v18  ;;  %v559_v28 = vunpack.i.h.bf16 %v556_v11  ;;  %v230_v16 = vld [vmem:[%s1230_s22 + $0x78] sm:$0xf] }
  0x28   : > { %v1275_v29 = vpack.i.bf16 %v477_v20, %v477_v20  ;;  %v1277_v30 = vpack.i.bf16 %v490_v21, %v490_v21  ;;  %v512_v31 = vmax.f32 %v510_v14, %v511_v22  ;;  %v549_v32 = vmax.f32 %v547_v15, %v548_v23 }
  0x29   : > { %v1279_v33 = vpack.i.bf16 %v501_v24, %v501_v24  ;;  %v525_v34 = vmax.f32 %v523_v17, %v524_v25  ;;  %v535_v35 = vrot.slane %v534_v27, 1  ;;  %v560_v36 = vmax.f32 %v558_v19, %v559_v28  ;;  %v231_v17 = vld [vmem:[%s1230_s22 + $0x7c] sm:$0xf] }
  0x2a   : > { %v690_v37 = vmax.bf16 %v1277_v30, %v1275_v29  ;;  %v1283_v38 = vpack.i.bf16 %v512_v31, %v512_v31  ;;  %v881_v41 = vsel %vm1271_vm10, %v1275_v29, %v1277_v30  ;;  %v550_v42 = vrot.slane %v549_v32, 2 }
  0x2b   : > { %v1297_v43 = vsel %vm1789_vm8, %v881_v41, %v1279_v33  ;;  %v536_v45 = vmax.f32 %v534_v27, %v535_v35  ;;  %v561_v46 = vrot.slane %v560_v36, 4  ;;  %v1302_v48 = vpack.i.bf16 %v525_v34, %v525_v34 }
  0x2c   : > { %v1300_v47 = vmax.bf16 %v690_v37, %v1279_v33  ;;  %v551_v49 = vmax.f32 %v549_v32, %v550_v42  ;;  %v568_v50 = vsel %vm1232_vm7, %v542_v53, 4286644096  ;;  %v886_v51 = vsel %vm1287_vm11, %v1297_v43, %v1283_v38 }
  0x2d   : > { %v1310_v52 = vpack.i.bf16 %v536_v45, %v536_v45  ;;  %v562_v54 = vmax.f32 %v560_v36, %v561_v46  ;;  %v569_v55 = vunpack.i.l.bf16 %v568_v50  ;;  %v570_v59 = vunpack.i.h.bf16 %v568_v50 }
  0x2e   : > { %v692_v56 = vmax.bf16 %v1300_v47, %v1283_v38  ;;  %v552_v58 = vrot.slane %v551_v49, 1  ;;  %v579_v53 = vsel %vm1223_vm5, %v1264_v57, 4286644096  ;;  %v591_v63 = vsel %vm1790_vm6, %v1264_v57, 4286644096 }
  0x2f   : > { %v563_v60 = vrot.slane %v562_v54, 2  ;;  %v580_v61 = vunpack.i.l.bf16 %v579_v53  ;;  %v581_v62 = vunpack.i.h.bf16 %v579_v53  ;;  %v571_v4 = vmax.f32 %v569_v55, %v570_v59 }
  0x30   : > { %v693_v0 = vmax.bf16 %v692_v56, %v1302_v48  ;;  %v553_v1 = vmax.f32 %v551_v49, %v552_v58  ;;  %v593_v5 = vunpack.i.l.bf16 %v591_v63  ;;  %v594_v10 = vunpack.i.h.bf16 %v591_v63 }
  0x31   : > { %v564_v8 = vmax.f32 %v562_v54, %v563_v60  ;;  %v582_v9 = vmax.f32 %v580_v61, %v581_v62  ;;  %v603_v11 = vsel %vm1232_vm7, %v1264_v57, 4286644096  ;;  %v572_v14 = vrot.slane %v571_v4, 4 }
  0x32   : > { %v694_v12 = vmax.bf16 %v693_v0, %v1310_v52  ;;  %v1326_v13 = vpack.i.bf16 %v553_v1, %v553_v1  ;;  %v604_v15 = vunpack.i.l.bf16 %v603_v11  ;;  %v595_v20 = vmax.f32 %v593_v5, %v594_v10 }
  0x33   : > { %v565_v18 = vrot.slane %v564_v8, 1  ;;  %v583_v19 = vrot.slane %v582_v9, 4  ;;  %v605_v21 = vunpack.i.h.bf16 %v603_v11  ;;  %v573_v23 = vmax.f32 %v571_v4, %v572_v14 }
  0x34   : > { %v695_v22 = vmax.bf16 %v694_v12, %v1326_v13  ;;  %v614_v24 = vmax.bf16 %v228_v6, %v1255_v39  ;;  %v615_v25 = vmax.bf16 %v229_v7, %v1260_v44  ;;  %v596_v28 = vrot.slane %v595_v20, 4 }
  0x35   : > { %v566_v57 = vmax.f32 %v564_v8, %v565_v18  ;;  %v584_v27 = vmax.f32 %v582_v9, %v583_v19  ;;  %v606_v31 = vmax.f32 %v604_v15, %v605_v21  ;;  %v574_v32 = vrot.slane %v573_v23, 2 }
  0x36   : > { %v616_v34 = vmax.bf16 %v614_v24, %v230_v16  ;;  %v1333_v35 = vmax.bf16 %v615_v25, %v231_v17  ;;  %v597_v41 = vmax.f32 %v595_v20, %v596_v28  ;;  %vm833_vm8 = vsmask.f32 6400 }
  0x37   : > { %v1335_v36 = vpack.i.bf16 %v566_v57, %v566_v57  ;;  %v585_v37 = vrot.slane %v584_v27, 2  ;;  %v607_v42 = vrot.slane %v606_v31, 4  ;;  %v575_v45 = vmax.f32 %v573_v23, %v574_v32 }
  0x38   : > { %v618_v39 = vsel %vm1223_vm5, %v616_v34, 4286644096  ;;  %v630_v44 = vsel %vm1790_vm6, %v616_v34, 4286644096  ;;  %v642_v46 = vsel %vm1232_vm7, %v616_v34, 4286644096  ;;  %vm1397_vm6 = vmand %vm1792_vm2, %vm824_vm9 }
  0x39   : > { %v696_v49 = vmax.bf16 %v695_v22, %v1335_v36  ;;  %v586_v50 = vmax.f32 %v584_v27, %v585_v37  ;;  %v598_v54 = vrot.slane %v597_v41, 2  ;;  %v608_v55 = vmax.f32 %v606_v31, %v607_v42  ;;  %vm1413_vm9 = vmand %vm832_vm13, %vm833_vm8 }
  0x3a   : > { %v576_v56 = vrot.slane %v575_v45, 1  ;;  %v619_v58 = vunpack.i.l.bf16 %v618_v39  ;;  %v620_v59 = vunpack.i.h.bf16 %v618_v39  ;;  %v632_v53 = vunpack.i.l.bf16 %v630_v44 }
  0x3b   : > { %v587_v60 = vrot.slane %v586_v50, 1  ;;  %v599_v61 = vmax.f32 %v597_v41, %v598_v54  ;;  %v609_v62 = vrot.slane %v608_v55, 2  ;;  %v633_v63 = vunpack.i.h.bf16 %v630_v44 }
  0x3c   : > { %v577_v0 = vmax.f32 %v575_v45, %v576_v56  ;;  %v621_v1 = vmax.f32 %v619_v58, %v620_v59  ;;  %v643_v4 = vunpack.i.l.bf16 %v642_v46  ;;  %v644_v5 = vunpack.i.h.bf16 %v642_v46 }
  0x3d   : > { %v588_v6 = vmax.f32 %v586_v50, %v587_v60  ;;  %v600_v7 = vrot.slane %v599_v61, 1  ;;  %v610_v8 = vmax.f32 %v608_v55, %v609_v62  ;;  %v634_v9 = vmax.f32 %v632_v53, %v633_v63 }
  0x3e   : > { %v1343_v10 = vpack.i.bf16 %v577_v0, %v577_v0  ;;  %v622_v11 = vrot.slane %v621_v1, 4  ;;  %v645_v12 = vmax.f32 %v643_v4, %v644_v5  ;;  %v653_v14 = vsel %vm1223_vm5, %v1333_v35, 4286644096 }
  0x3f   : > { %v1348_v15 = vpack.i.bf16 %v588_v6, %v588_v6  ;;  %v601_v16 = vmax.f32 %v599_v61, %v600_v7  ;;  %v611_v17 = vrot.slane %v610_v8, 1  ;;  %v635_v18 = vrot.slane %v634_v9, 4 }
  0x40   : > { %v697_v19 = vmax.bf16 %v696_v49, %v1343_v10  ;;  %v623_v20 = vmax.f32 %v621_v1, %v622_v11  ;;  %v646_v21 = vrot.slane %v645_v12, 4  ;;  %v654_v22 = vunpack.i.l.bf16 %v653_v14 }
  0x41   : > { %v1351_v23 = vpack.i.bf16 %v601_v16, %v601_v16  ;;  %v612_v24 = vmax.f32 %v610_v8, %v611_v17  ;;  %v636_v25 = vmax.f32 %v634_v9, %v635_v18  ;;  %v655_v57 = vunpack.i.h.bf16 %v653_v14 }
  0x42   : > { %v889_v27 = vsel %vm1788_vm4, %v886_v51, %v1302_v48  ;;  %v698_v28 = vmax.bf16 %v697_v19, %v1348_v15  ;;  %v624_v31 = vrot.slane %v623_v20, 2  ;;  %v647_v32 = vmax.f32 %v645_v12, %v646_v21  ;;  %vm1372_vm4 = vmand %vm805_vm14, %vm806_vm15  ;;  %v200_v21 = vld [vmem:[%s1230_s22] sm:$0xf] }
  0x43   : > { %v637_v37 = vrot.slane %v636_v25, 2  ;;  %v656_v41 = vmax.f32 %v654_v22, %v655_v57  ;;  %v1368_v45 = vpack.i.bf16 %v612_v24, %v612_v24  ;;  %v891_v49 = vsel %vm1363_vm3, %v889_v27, %v1310_v52  ;;  %vm1385_vm15 = vmand %vm814_vm0, %vm815_vm1  ;;  %v202_v22 = vld [vmem:[%s1230_s22 + $0x8] sm:$0xf] }
  0x44   : > { %v699_v42 = vmax.bf16 %v698_v28, %v1351_v23  ;;  %v625_v43 = vmax.f32 %v623_v20, %v624_v31  ;;  %v648_v39 = vrot.slane %v647_v32, 2  ;;  %v745_v55 = vmax.bf16 %v1302_v48, %v1283_v38 }
  0x45   : > { %v638_v51 = vmax.f32 %v636_v25, %v637_v37  ;;  %v657_v44 = vrot.slane %v656_v41, 4  ;;  %v739_v59 = vmax.bf16 %v1300_v47, %v1326_v13  ;;  %v1813_v53 = vmov 0 }
  0x46   : > { %v626_v50 = vrot.slane %v625_v43, 1  ;;  %v649_v54 = vmax.f32 %v647_v32, %v648_v39  ;;  %v1814_v53 = vsel %vm1385_vm15, 4294967295, %v1813_v53  ;;  %v894_v60 = vsel %vm1791_vm12, %v891_v49, %v1326_v13 }
  0x47   : > { %v639_v56 = vrot.slane %v638_v51, 1  ;;  %v658_v58 = vmax.f32 %v656_v41, %v657_v44  ;;  %1815 = vst [vmem:[#allocation2_spill] sm:$0xff] %v1814_v53  ;;  %v700_v61 = vmax.bf16 %v699_v42, %v1368_v45  ;;  %v896_v0 = vsel %vm1372_vm4, %v894_v60, %v1335_v36  ;;  %v201_v41 = vld [vmem:[%s1230_s22 + $0x4] sm:$0xf]  ;;  %v203_v42 = vld [vmem:[%s1230_s22 + $0xc] sm:$0xf] }
  0x48   : > { %v627_v62 = vmax.f32 %v625_v43, %v626_v50  ;;  %v650_v63 = vrot.slane %v649_v54, 1  ;;  %v1816_v47 = vmov 0  ;;  %vm841_vm1 = vcmask 1047552   ;;  %v1464_v60 = vld [vmem:[%s1230_s22 + $0x14] sm:$0xf] }
  0x49   : > { %v640_v1 = vmax.f32 %v638_v51, %v639_v56  ;;  %v659_v4 = vrot.slane %v658_v58, 2  ;;  %v1817_v47 = vsel %vm1397_vm6, 4294967295, %v1816_v47  ;;  %v899_v5 = vsel %vm805_vm14, %v896_v0, %v1343_v10 }
  0x4a   : > { %1818 = vst [vmem:[#allocation3_spill] sm:$0xff] %v1817_v47  ;;  %v1403_v6 = vpack.i.bf16 %v627_v62, %v627_v62  ;;  %v651_v7 = vmax.f32 %v649_v54, %v650_v63  ;;  %v746_v8 = vmax.bf16 %v745_v55, %v1310_v52  ;;  %v901_v9 = vsel %vm1385_vm15, %v899_v5, %v1348_v15  ;;  %v1456_v54 = vld [vmem:[%s1230_s22 + $0x10] sm:$0xf]  ;;  %v1459_v55 = vld [vmem:[%s1230_s22 + $0x18] sm:$0xf] }
  0x4b   : > { %v1409_v11 = vpack.i.bf16 %v640_v1, %v640_v1  ;;  %v660_v12 = vmax.f32 %v658_v58, %v659_v4  ;;  %v1819_v14 = vmov 0  ;;  %vm842_vm12 = vsmask.f32 7424  ;;  %v214_v62 = vld [vmem:[%s1230_s22 + $0x38] sm:$0xf] }
  0x4c   : > { %v1820_v14 = vsel %vm1413_vm9, 4294967295, %v1819_v14  ;;  %v904_v16 = vsel %vm814_vm0, %v901_v9, %v1351_v23  ;;  %v701_v17 = vmax.bf16 %v700_v61, %v1403_v6  ;;  %v1420_v18 = vpack.i.bf16 %v651_v7, %v651_v7 }
  0x4d   : > { %1821 = vst [vmem:[#allocation4_spill] sm:$0xff] %v1820_v14  ;;  %v1423_v19 = vmax.bf16 %v739_v59, %v1335_v36  ;;  %v906_v20 = vsel %vm1397_vm6, %v904_v16, %v1368_v45  ;;  %v661_v24 = vrot.slane %v660_v12, 1  ;;  %vm1822_vm8 = vcmask 26625  }
  0x4e   : > { %v909_v25 = vsel %vm1792_vm2, %v906_v20, %v1403_v6  ;;  %v665_v57 = vsel %vm1822_vm8, %v1333_v35, 4286644096  ;;  %v677_v27 = vsel %vm1232_vm7, %v1333_v35, 4286644096  ;;  %v702_v28 = vmax.bf16 %v701_v17, %v1409_v11  ;;  %vm1449_vm8 = vmand %vm841_vm1, %vm842_vm12 }
  0x4f   : > { %v747_v31 = vmax.bf16 %v746_v8, %v1348_v15  ;;  %v911_v32 = vsel %vm1413_vm9, %v909_v25, %v1409_v11  ;;  %v667_v37 = vunpack.i.l.bf16 %v665_v57  ;;  %v662_v43 = vmax.f32 %v660_v12, %v661_v24 }
  0x50   : > { %v668_v39 = vunpack.i.h.bf16 %v665_v57  ;;  %v678_v51 = vunpack.i.l.bf16 %v677_v27  ;;  %v1445_v44 = vmax.bf16 %v702_v28, %v1420_v18  ;;  %v1823_v35 = vmov 0 }
  0x51   : > { %v1824_v35 = vsel %vm1449_vm8, 4294967295, %v1823_v35  ;;  %v914_v49 = vsel %vm832_vm13, %v911_v32, %v1420_v18  ;;  %v679_v50 = vunpack.i.h.bf16 %v677_v27  ;;  %v232_v56 = vmax.bf16 %v202_v22, %v200_v21 }
  0x52   : > { %1825 = vst [vmem:[#allocation5_spill] sm:$0xff] %v1824_v35  ;;  %v1461_v58 = vpack.i.bf16 %v662_v43, %v662_v43  ;;  %vm929_vm2 = vcmask 31744   ;;  %v669_v59 = vmax.f32 %v667_v37, %v668_v39  ;;  %v233_v61 = vmax.bf16 %v203_v42, %v201_v41 }
  0x53   : > { %v1469_v63 = vmax.bf16 %v747_v31, %v1351_v23  ;;  %v680_v0 = vmax.f32 %v678_v51, %v679_v50  ;;  %v234_v1 = vmax.bf16 %v232_v56, %v1456_v54  ;;  %vm1826_vm12 = vcmask 26625  }
  0x54   : > { %v704_v4 = vmax.bf16 %v1445_v44, %v1461_v58  ;;  %v916_v5 = vsel %vm1449_vm8, %v914_v49, %v1461_v58  ;;  %v670_v7 = vrot.slane %v669_v59, 4  ;;  %v235_v12 = vmax.bf16 %v233_v61, %v1464_v60  ;;  %vm1827_vm1 = vmmov %vm1826_vm12 }
  0x55   : > { %1155 = vmatprep.mubr.msk.bf16.mxu1 %vm929_vm2, %v916_v5  ;;  %v681_v9 = vrot.slane %v680_v0, 4  ;;  %v239_v16 = vsel %vm1223_vm5, %v234_v1, 4286644096  ;;  %v253_v17 = vsel %vm1826_vm12, %v234_v1, 4286644096  ;;  %vm1828_vm12 = vcmask 1040384  }
  0x56   : > { %v671_v20 = vmax.f32 %v669_v59, %v670_v7  ;;  %v240_v21 = vunpack.i.l.bf16 %v239_v16  ;;  %v241_v22 = vunpack.i.h.bf16 %v239_v16  ;;  %v255_v24 = vunpack.i.l.bf16 %v253_v17  ;;  %v207_v7 = vld [vmem:[%s1230_s22 + $0x1c] sm:$0xf] }
  0x57   : > { %v682_v25 = vmax.f32 %v680_v0, %v681_v9  ;;  %v256_v57 = vunpack.i.h.bf16 %v253_v17  ;;  %v268_v27 = vsel %vm1232_vm7, %v234_v1, 4286644096  ;;  %v279_v28 = vsel %vm1223_vm5, %v235_v12, 4286644096 }
  0x58   : > { %v672_v31 = vrot.slane %v671_v20, 2  ;;  %v242_v32 = vmax.f32 %v240_v21, %v241_v22  ;;  %v269_v37 = vunpack.i.l.bf16 %v268_v27  ;;  %v270_v41 = vunpack.i.h.bf16 %v268_v27 }
  0x59   : > { %v683_v42 = vrot.slane %v682_v25, 2  ;;  %v257_v43 = vmax.f32 %v255_v24, %v256_v57  ;;  %v280_v39 = vunpack.i.l.bf16 %v279_v28  ;;  %v281_v51 = vunpack.i.h.bf16 %v279_v28 }
  0x5a   : > { %v673_v44 = vmax.f32 %v671_v20, %v672_v31  ;;  %v243_v49 = vrot.slane %v242_v32, 4  ;;  %v271_v50 = vmax.f32 %v269_v37, %v270_v41  ;;  %v291_v56 = vsel %vm1827_vm1, %v235_v12, 4286644096 }
  0x5b   : > { %v684_v59 = vmax.f32 %v682_v25, %v683_v42  ;;  %v258_v61 = vrot.slane %v257_v43, 4  ;;  %v282_v0 = vmax.f32 %v280_v39, %v281_v51  ;;  %v293_v1 = vunpack.i.l.bf16 %v291_v56 }
  0x5c   : > { %v674_v5 = vrot.slane %v673_v44, 1  ;;  %v244_v9 = vmax.f32 %v242_v32, %v243_v49  ;;  %v272_v16 = vrot.slane %v271_v50, 4  ;;  %v294_v17 = vunpack.i.h.bf16 %v291_v56 }
  0x5d   : > { %v685_v21 = vrot.slane %v684_v59, 1  ;;  %v259_v22 = vmax.f32 %v257_v43, %v258_v61  ;;  %v283_v24 = vrot.slane %v282_v0, 4  ;;  %v303_v20 = vsel %vm1232_vm7, %v235_v12, 4286644096  ;;  %v212_v12 = vld [vmem:[%s1230_s22 + $0x30] sm:$0xf] }
  0x5e   : > { %v675_v57 = vmax.f32 %v673_v44, %v674_v5  ;;  %v245_v27 = vrot.slane %v244_v9, 2  ;;  %v273_v28 = vmax.f32 %v271_v50, %v272_v16  ;;  %v295_v25 = vmax.f32 %v293_v1, %v294_v17  ;;  %v208_v61 = vld [vmem:[%s1230_s22 + $0x20] sm:$0xf] }
  0x5f   : > { %v686_v31 = vmax.f32 %v684_v59, %v685_v21  ;;  %v260_v37 = vrot.slane %v259_v22, 2  ;;  %v284_v41 = vmax.f32 %v282_v0, %v283_v24  ;;  %v315_v42 = vmax.bf16 %v207_v7, %v1464_v60  ;;  %v209_v7 = vld [vmem:[%s1230_s22 + $0x24] sm:$0xf]  ;;  %v1509_v24 = vld [vmem:[%s1230_s22 + $0x2c] sm:$0xf] }
  0x60   : > { %v1493_v32 = vpack.i.bf16 %v675_v57, %v675_v57  ;;  %v246_v43 = vmax.f32 %v244_v9, %v245_v27  ;;  %v274_v39 = vrot.slane %v273_v28, 2  ;;  %v296_v51 = vrot.slane %v295_v25, 4  ;;  %v210_v9 = vld [vmem:[%s1230_s22 + $0x28] sm:$0xf] }
  0x61   : > { %v1495_v49 = vpack.i.bf16 %v686_v31, %v686_v31  ;;  %v261_v44 = vmax.f32 %v259_v22, %v260_v37  ;;  %v285_v50 = vrot.slane %v284_v41, 2  ;;  %v304_v56 = vunpack.i.l.bf16 %v303_v20 }
  0x62   : > { %v705_v59 = vmax.bf16 %v704_v4, %v1493_v32  ;;  %v247_v0 = vrot.slane %v246_v43, 1  ;;  %v275_v60 = vmax.f32 %v273_v28, %v274_v39  ;;  %v305_v1 = vunpack.i.h.bf16 %v303_v20  ;;  %v1513_v20 = vld [vmem:[%s1230_s22 + $0x34] sm:$0xf] }
  0x63   : > { %v917_v5 = vsel %vm1271_vm10, %v1493_v32, %v1495_v49  ;;  %v262_v16 = vrot.slane %v261_v44, 1  ;;  %v286_v17 = vmax.f32 %v284_v41, %v285_v50  ;;  %v297_v21 = vmax.f32 %v295_v25, %v296_v51 }
  0x64   : > { %v706_v22 = vmax.bf16 %v705_v59, %v1495_v49  ;;  %v920_v4 = vsel %vm1828_vm12, %v917_v5, 0  ;;  %v248_v57 = vmax.f32 %v246_v43, %v247_v0  ;;  %v390_v27 = vmax.bf16 %v212_v12, %v210_v9  ;;  %vm1830_vm12 = vmmov %vm1827_vm1 }
  0x65   : > { %1156 = vmatmul.mubr.msk.bf16.vlgmr.msra.gmra.mrb[0].mxu1 %vm929_vm2, %v920_v4  ;;  %v263_v28 = vmax.f32 %v261_v44, %v262_v16  ;;  %v276_v31 = vrot.slane %v275_v60, 1  ;;  %v287_v37 = vrot.slane %v286_v17, 1  ;;  %v298_v39 = vrot.slane %v297_v21, 2 }
  0x66   : > { %v1516_v8 = vpack.i.bf16 %v248_v57, %v248_v57  ;;  %v306_v25 = vmax.f32 %v304_v56, %v305_v1  ;;  %v1829_v41 = vmax.bf16 %v1459_v55, %v1456_v54  ;;  %v317_v50 = vmax.bf16 %v315_v42, %v209_v7 }
  0x67   : > { %v1521_v59 = vpack.i.bf16 %v263_v28, %v263_v28  ;;  %v277_v43 = vmax.f32 %v275_v60, %v276_v31  ;;  %v288_v12 = vmax.f32 %v286_v17, %v287_v37  ;;  %v299_v0 = vmax.f32 %v297_v21, %v298_v39 }
  0x68   : > { %v316_v51 = vmax.bf16 %v1829_v41, %v208_v61  ;;  %v307_v5 = vrot.slane %v306_v25, 4  ;;  %v319_v44 = vmax.bf16 %v317_v50, %v1509_v24  ;;  %v391_v16 = vmax.bf16 %v1513_v20, %v1509_v24 }
  0x69   : > { %v1526_v57 = vpack.i.bf16 %v277_v43, %v277_v43  ;;  %v1528_v56 = vpack.i.bf16 %v288_v12, %v288_v12  ;;  %v300_v1 = vrot.slane %v299_v0, 1  ;;  %v1530_v54 = vmax.bf16 %v390_v27, %v214_v62 }
  0x6a   : > { %v318_v4 = vmax.bf16 %v316_v51, %v210_v9  ;;  %v308_v55 = vmax.f32 %v306_v25, %v307_v5  ;;  %v355_v39 = vsel %vm1223_vm5, %v319_v44, 4286644096  ;;  %v1583_v3 = vmax.bf16 %v1521_v59, %v1516_v8 }
  0x6b   : > { %v707_v7 = vmax.bf16 %v706_v22, %v1528_v56  ;;  %v301_v9 = vmax.f32 %v299_v0, %v300_v1  ;;  %v356_v51 = vunpack.i.l.bf16 %v355_v39  ;;  %v357_v50 = vunpack.i.h.bf16 %v355_v39 }
  0x6c   : > { %v320_v42 = vsel %vm1223_vm5, %v318_v4, 4286644096  ;;  %v332_v61 = vsel %vm1827_vm1, %v318_v4, 4286644096  ;;  %v344_v60 = vsel %vm1232_vm7, %v318_v4, 4286644096 }
  0x6d   : > { %v321_v17 = vunpack.i.l.bf16 %v320_v42  ;;  %v322_v21 = vunpack.i.h.bf16 %v320_v42  ;;  %v309_v24 = vrot.slane %v308_v55, 2  ;;  %v334_v20 = vunpack.i.l.bf16 %v332_v61 }
  0x6e   : > { %v335_v28 = vunpack.i.h.bf16 %v332_v61  ;;  %v345_v31 = vunpack.i.l.bf16 %v344_v60  ;;  %v1538_v62 = vpack.i.bf16 %v301_v9, %v301_v9  ;;  %v346_v37 = vunpack.i.h.bf16 %v344_v60  ;;  %v215_v61 = vld [vmem:[%s1230_s22 + $0x3c] sm:$0xf] }
  0x6f   : > { %v323_v27 = vmax.f32 %v321_v17, %v322_v21  ;;  %v310_v25 = vmax.f32 %v308_v55, %v309_v24  ;;  %v367_v0 = vsel %vm1830_vm12, %v319_v44, 4286644096  ;;  %v358_v1 = vmax.f32 %v356_v51, %v357_v50  ;;  %vm1831_vm12 = vmmov %vm1827_vm1 }
  0x70   : > { %v336_v41 = vmax.f32 %v334_v20, %v335_v28  ;;  %v708_v22 = vmax.bf16 %v707_v7, %v1538_v62  ;;  %v347_v12 = vmax.f32 %v345_v31, %v346_v37  ;;  %v369_v42 = vunpack.i.l.bf16 %v367_v0 }
  0x71   : > { %v324_v43 = vrot.slane %v323_v27, 4  ;;  %v311_v5 = vrot.slane %v310_v25, 1  ;;  %v370_v17 = vunpack.i.h.bf16 %v367_v0  ;;  %v379_v55 = vsel %vm1232_vm7, %v319_v44, 4286644096 }
  0x72   : > { %v337_v4 = vrot.slane %v336_v41, 4  ;;  %v348_v60 = vrot.slane %v347_v12, 4  ;;  %v359_v20 = vrot.slane %v358_v1, 4  ;;  %v380_v28 = vunpack.i.l.bf16 %v379_v55 }
  0x73   : > { %v325_v9 = vmax.f32 %v323_v27, %v324_v43  ;;  %v312_v21 = vmax.f32 %v310_v25, %v311_v5  ;;  %v371_v31 = vmax.f32 %v369_v42, %v370_v17  ;;  %v381_v37 = vunpack.i.h.bf16 %v379_v55 }
  0x74   : > { %v338_v24 = vmax.f32 %v336_v41, %v337_v4  ;;  %v349_v39 = vmax.f32 %v347_v12, %v348_v60  ;;  %v360_v51 = vmax.f32 %v358_v1, %v359_v20  ;;  %v393_v50 = vmax.bf16 %v391_v16, %v215_v61 }
  0x75   : > { %v326_v7 = vrot.slane %v325_v9, 2  ;;  %v1547_v35 = vpack.i.bf16 %v312_v21, %v312_v21  ;;  %v372_v43 = vrot.slane %v371_v31, 4  ;;  %v382_v0 = vmax.f32 %v380_v28, %v381_v37 }
  0x76   : > { %v339_v14 = vrot.slane %v338_v24, 2  ;;  %v350_v27 = vrot.slane %v349_v39, 2  ;;  %v361_v25 = vrot.slane %v360_v51, 2  ;;  %v394_v41 = vsel %vm1223_vm5, %v1530_v54, 4286644096 }
  0x77   : > { %v327_v47 = vmax.f32 %v325_v9, %v326_v7  ;;  %v709_v53 = vmax.bf16 %v708_v22, %v1547_v35  ;;  %v373_v4 = vmax.f32 %v371_v31, %v372_v43  ;;  %v383_v42 = vrot.slane %v382_v0, 4 }
  0x78   : > { %v340_v44 = vmax.f32 %v338_v24, %v339_v14  ;;  %v351_v5 = vmax.f32 %v349_v39, %v350_v27  ;;  %v362_v17 = vmax.f32 %v360_v51, %v361_v25  ;;  %v395_v1 = vunpack.i.l.bf16 %v394_v41 }
  0x79   : > { %v328_v12 = vrot.slane %v327_v47, 1  ;;  %v396_v16 = vunpack.i.h.bf16 %v394_v41  ;;  %v374_v55 = vrot.slane %v373_v4, 2  ;;  %v384_v21 = vmax.f32 %v382_v0, %v383_v42 }
  0x7a   : > { %v341_v60 = vrot.slane %v340_v44, 1  ;;  %v352_v9 = vrot.slane %v351_v5, 1  ;;  %v363_v22 = vrot.slane %v362_v17, 1  ;;  %v406_v24 = vsel %vm1827_vm1, %v1530_v54, 4286644096 }
  0x7b   : > { %v329_v61 = vmax.f32 %v327_v47, %v328_v12  ;;  %v397_v14 = vmax.f32 %v395_v1, %v396_v16  ;;  %v375_v39 = vmax.f32 %v373_v4, %v374_v55  ;;  %v385_v31 = vrot.slane %v384_v21, 2 }
  0x7c   : > { %v342_v20 = vmax.f32 %v340_v44, %v341_v60  ;;  %v353_v7 = vmax.f32 %v351_v5, %v352_v9  ;;  %v364_v51 = vmax.f32 %v362_v17, %v363_v22  ;;  %v408_v43 = vunpack.i.l.bf16 %v406_v24 }
  0x7d   : > { %v1555_v28 = vpack.i.bf16 %v329_v61, %v329_v61  ;;  %v398_v27 = vrot.slane %v397_v14, 4  ;;  %v376_v0 = vrot.slane %v375_v39, 1  ;;  %v386_v44 = vmax.f32 %v384_v21, %v385_v31 }
  0x7e   : > { %v1557_v37 = vpack.i.bf16 %v342_v20, %v342_v20  ;;  %v1560_v25 = vpack.i.bf16 %v353_v7, %v353_v7  ;;  %v1562_v41 = vpack.i.bf16 %v364_v51, %v364_v51  ;;  %v409_v42 = vunpack.i.h.bf16 %v406_v24 }
  0x7f   : > { %v710_v47 = vmax.bf16 %v709_v53, %v1555_v28  ;;  %v399_v12 = vmax.f32 %v397_v14, %v398_v27  ;;  %v418_v5 = vsel %vm1232_vm7, %v1530_v54, 4286644096  ;;  %v377_v60 = vmax.f32 %v375_v39, %v376_v0 }
  0x80   : > { %v387_v17 = vrot.slane %v386_v44, 1  ;;  %v419_v1 = vunpack.i.l.bf16 %v418_v5  ;;  %v410_v61 = vmax.f32 %v408_v43, %v409_v42  ;;  %v420_v53 = vunpack.i.h.bf16 %v418_v5 }
  0x81   : > { %v711_v4 = vmax.bf16 %v710_v47, %v1557_v37  ;;  %v400_v16 = vrot.slane %v399_v12, 2  ;;  %v429_v9 = vsel %vm1223_vm5, %v393_v50, 4286644096  ;;  %v1571_v21 = vpack.i.bf16 %v377_v60, %v377_v60 }
  0x82   : > { %v388_v20 = vmax.f32 %v386_v44, %v387_v17  ;;  %v430_v22 = vunpack.i.l.bf16 %v429_v9  ;;  %v411_v24 = vrot.slane %v410_v61, 4  ;;  %v421_v54 = vmax.f32 %v419_v1, %v420_v53 }
  0x83   : > { %v712_v55 = vmax.bf16 %v711_v4, %v1560_v25  ;;  %v401_v14 = vmax.f32 %v399_v12, %v400_v16  ;;  %v431_v7 = vunpack.i.h.bf16 %v429_v9  ;;  %v441_v51 = vsel %vm1831_vm12, %v393_v50, 4286644096 }
  0x84   : > { %v1574_v31 = vpack.i.bf16 %v388_v20, %v388_v20  ;;  %v453_v2 = vsel %vm1232_vm7, %v393_v50, 4286644096  ;;  %v412_v43 = vmax.f32 %v410_v61, %v411_v24  ;;  %v422_v47 = vrot.slane %v421_v54, 4 }
  0x85   : > { %v713_v39 = vmax.bf16 %v712_v55, %v1562_v41  ;;  %v402_v27 = vrot.slane %v401_v14, 1  ;;  %v432_v0 = vmax.f32 %v430_v22, %v431_v7  ;;  %v443_v42 = vunpack.i.l.bf16 %v441_v51 }
  0x86   : > { %v444_v12 = vunpack.i.h.bf16 %v441_v51  ;;  %v454_v5 = vunpack.i.l.bf16 %v453_v2  ;;  %v413_v60 = vrot.slane %v412_v43, 2  ;;  %v423_v17 = vmax.f32 %v421_v54, %v422_v47 }
  0x87   : > { %v714_v44 = vmax.bf16 %v713_v39, %v1571_v21  ;;  %v403_v4 = vmax.f32 %v401_v14, %v402_v27  ;;  %v433_v1 = vrot.slane %v432_v0, 4  ;;  %v455_v9 = vunpack.i.h.bf16 %v453_v2 }
  0x88   : > { %v445_v53 = vmax.f32 %v443_v42, %v444_v12  ;;  %v414_v61 = vmax.f32 %v412_v43, %v413_v60  ;;  %v424_v55 = vrot.slane %v423_v17, 2  ;;  %v1589_v14 = vmax.bf16 %v1583_v3, %v1526_v57 }
  0x89   : > { %v715_v16 = vmax.bf16 %v714_v44, %v1574_v31  ;;  %v1585_v50 = vpack.i.bf16 %v403_v4, %v403_v4  ;;  %v434_v20 = vmax.f32 %v432_v0, %v433_v1  ;;  %v456_v24 = vmax.f32 %v454_v5, %v455_v9 }
  0x8a   : > { %v446_v22 = vrot.slane %v445_v53, 4  ;;  %v729_v54 = vmax.bf16 %v1538_v62, %v1528_v56  ;;  %v749_v7 = vmax.bf16 %v1469_v63, %v1368_v45  ;;  %v415_v39 = vrot.slane %v414_v61, 1 }
  0x8b   : > { %v425_v51 = vmax.f32 %v423_v17, %v424_v55  ;;  %v435_v2 = vrot.slane %v434_v20, 2  ;;  %v457_v47 = vrot.slane %v456_v24, 4  ;;  %v723_v43 = vmax.bf16 %v1589_v14, %v1555_v28 }
  0x8c   : > { %v447_v27 = vmax.f32 %v445_v53, %v446_v22  ;;  %v730_v0 = vmax.bf16 %v729_v54, %v1547_v35  ;;  %v716_v44 = vmax.bf16 %v715_v16, %v1585_v50  ;;  %v416_v42 = vmax.f32 %v414_v61, %v415_v39 }
  0x8d   : > { %v426_v12 = vrot.slane %v425_v51, 1  ;;  %v436_v5 = vmax.f32 %v434_v20, %v435_v2  ;;  %v458_v60 = vmax.f32 %v456_v24, %v457_v47  ;;  %v724_v1 = vmax.bf16 %v723_v43, %v1557_v37 }
  0x8e   : > { %v448_v4 = vrot.slane %v447_v27, 2  ;;  %v731_v63 = vmax.bf16 %v730_v0, %v1562_v41  ;;  %v1832_v17 = vmax.bf16 %v1423_v19, %v1343_v10  ;;  %v1605_v9 = vpack.i.bf16 %v416_v42, %v416_v42 }
  0x8f   : > { %v427_v55 = vmax.f32 %v425_v51, %v426_v12  ;;  %v437_v22 = vrot.slane %v436_v5, 1  ;;  %v459_v16 = vrot.slane %v458_v60, 2  ;;  %v725_v61 = vmax.bf16 %v724_v1, %v1560_v25 }
  0x90   : > { %v742_v53 = vmax.bf16 %v1832_v17, %v1403_v6  ;;  %v449_v54 = vmax.f32 %v447_v27, %v448_v4  ;;  %v732_v20 = vmax.bf16 %v731_v63, %v1571_v21  ;;  %v750_v24 = vmax.bf16 %v749_v7, %v1461_v58 }
  0x91   : > { %v717_v39 = vmax.bf16 %v716_v44, %v1605_v9  ;;  %v1611_v2 = vpack.i.bf16 %v427_v55, %v427_v55  ;;  %v438_v47 = vmax.f32 %v436_v5, %v437_v22  ;;  %v460_v19 = vmax.f32 %v458_v60, %v459_v16 }
  0x92   : > { %v450_v43 = vrot.slane %v449_v54, 1  ;;  %v726_v0 = vmax.bf16 %v725_v61, %v1585_v50  ;;  %v733_v51 = vmax.bf16 %v732_v20, %v1574_v31  ;;  %v743_v27 = vmax.bf16 %v742_v53, %v1409_v11 }
  0x93   : > { %v718_v42 = vmax.bf16 %v717_v39, %v1611_v2  ;;  %v1617_v12 = vpack.i.bf16 %v438_v47, %v438_v47  ;;  %v461_v1 = vrot.slane %v460_v19, 1  ;;  %v751_v7 = vmax.bf16 %v750_v24, %v1493_v32 }
  0x94   : > { %v451_v4 = vmax.f32 %v449_v54, %v450_v43  ;;  %v727_v17 = vmax.bf16 %v726_v0, %v1605_v9  ;;  %v744_v55 = vmax.bf16 %v743_v27, %v1420_v18  ;;  %v755_v53 = vmax.bf16 %v1528_v56, %v1526_v57 }
  0x95   : > { %v719_v44 = vmax.bf16 %v718_v42, %v1617_v12  ;;  %v734_v5 = vmax.bf16 %v733_v51, %v1617_v12  ;;  %v462_v60 = vmax.f32 %v460_v19, %v461_v1  ;;  %v758_v61 = vmax.bf16 %v1547_v35, %v1538_v62 }
  0x96   : > { %v1622_v63 = vpack.i.bf16 %v451_v4, %v451_v4  ;;  %v752_v20 = vmax.bf16 %v751_v7, %v1495_v49  ;;  %v753_v24 = vmax.bf16 %v1583_v3, %v1555_v28  ;;  %v761_v39 = vmax.bf16 %v1605_v9, %v1585_v50 }
  0x97   : > { %v1629_v54 = vpack.i.bf16 %v462_v60, %v462_v60  ;;  %v776_v47 = vmax.bf16 %v1368_v45, %v1351_v23  ;;  %v728_v19 = vmax.bf16 %v727_v17, %v1611_v2  ;;  %v764_v0 = vmax.bf16 %v1617_v12, %v1611_v2 }
  0x98   : > { %v720_v22 = vmax.bf16 %v719_v44, %v1622_v63  ;;  %v735_v16 = vmax.bf16 %v734_v5, %v1622_v63  ;;  %v845_v51 = vsel %vm1271_vm10, %v1526_v57, %v1528_v56  ;;  %v756_v27 = vmax.bf16 %v755_v53, %v1560_v25 }
  0x99   : > { %v767_v42 = vmax.bf16 %v1629_v54, %v1622_v63  ;;  %v777_v23 = vmax.bf16 %v776_v47, %v1493_v32  ;;  %v759_v4 = vmax.bf16 %v758_v61, %v1571_v21  ;;  %v770_v1 = vmax.bf16 %v1335_v36, %v1326_v13 }
  0x9a   : > { %v721_v43 = vmax.bf16 %v720_v22, %v1629_v54  ;;  %v736_v3 = vmax.bf16 %v735_v16, %v1629_v54  ;;  %vm1833_vm5 = vcmask 1040384   ;;  %v762_v57 = vmax.bf16 %v761_v39, %v1275_v29 }
  0x9b   : > { %v848_v7 = vsel %vm1833_vm5, %v845_v51, %v1538_v62  ;;  %v773_v56 = vmax.bf16 %v1348_v15, %v1343_v10  ;;  %v778_v44 = vmax.bf16 %v777_v23, %v1495_v49  ;;  %v765_v5 = vmax.bf16 %v764_v0, %v1279_v33  ;;  %vm1835_vm1 = vmmov %vm1833_vm5 }
  0x9c   : > { %v722_v45 = vmax.bf16 %v721_v43, %v1589_v14  ;;  %v850_v32 = vsel %vm1287_vm11, %v848_v7, %v1547_v35  ;;  %v754_v14 = vmax.bf16 %v753_v24, %v1557_v37  ;;  %vm1834_vm7 = vcmask 1041408  }
  0x9d   : > { %v853_v36 = vsel %vm1834_vm7, %v850_v32, %v1555_v28  ;;  %v757_v29 = vmax.bf16 %v756_v27, %v1562_v41  ;;  %v768_v10 = vmax.bf16 %v767_v42, %v1302_v48  ;;  %v760_v49 = vmax.bf16 %v759_v4, %v1574_v31  ;;  %vm1837_vm12 = vmmov %vm1834_vm7  ;;  %v1013_v27 = vld [vmem:[%s1786_s3 + $0x28] sm:$0xff] }
  0x9e   : > { %v782_v13 = vsel %vm1271_vm10, %v722_v45, %v728_v19  ;;  %v855_v35 = vsel %vm1363_vm3, %v853_v36, %v1557_v37  ;;  %v771_v33 = vmax.bf16 %v770_v1, %v1403_v6  ;;  %vm1836_vm10 = vcmask 1042432   ;;  %v1011_v36 = vld [vmem:[%s1786_s3 + $0x18] sm:$0xff] }
  0x9f   : > { %v786_v15 = vsel %vm1835_vm1, %v782_v13, %v736_v3  ;;  %v858_v62 = vsel %vm1836_vm10, %v855_v35, %v1560_v25  ;;  %v763_v28 = vmax.bf16 %v762_v57, %v1277_v30  ;;  %v774_v48 = vmax.bf16 %v773_v56, %v1420_v18  ;;  %v1010_v56 = vld [vmem:[%s1786_s3 + $0x10] sm:$0xff]  ;;  %v1009_v35 = vld [vmem:[%s1786_s3 + $0x8] sm:$0xff] }
  0xa0   : > { %v790_v26 = vsel %vm1287_vm11, %v786_v15, %v744_v55  ;;  %v860_v37 = vsel %vm1372_vm4, %v858_v62, %v1562_v41  ;;  %v766_v17 = vmax.bf16 %v765_v5, %v1283_v38  ;;  %v769_v25 = vmax.bf16 %v768_v10, %v1310_v52  ;;  %vm1838_vm11 = vmmov %vm1836_vm10 }
  0xa1   : > { %v794_v60 = vsel %vm1837_vm12, %v790_v26, %v752_v20  ;;  %v863_v40 = vsel %vm805_vm14, %v860_v37, %v1571_v21  ;;  %v772_v53 = vmax.bf16 %v771_v33, %v1409_v11  ;;  %v775_v34 = vmax.bf16 %v774_v48, %v1461_v58 }
  0xa2   : > { %v799_v6 = vsel %vm1363_vm3, %v794_v60, %v754_v14  ;;  %v865_v55 = vsel %vm1385_vm15, %v863_v40, %v1574_v31  ;;  %vm1841_vm3 = vcmask 1045504   ;;  %v1008_v14 = vld [vmem:[%s1786_s3] sm:$0xff] }
  0xa3   : > { %v803_v30 = vsel %vm1838_vm11, %v799_v6, %v757_v29  ;;  %v868_v38 = vsel %vm814_vm0, %v865_v55, %v1585_v50 }
  0xa4   : > { %v808_v41 = vsel %vm1372_vm4, %v803_v30, %v760_v49  ;;  %v870_v22 = vsel %vm1397_vm6, %v868_v38, %v1605_v9  ;;  %vm1843_vm4 = vmmov %vm1841_vm3 }
  0xa5   : > { %v812_v21 = vsel %vm805_vm14, %v808_v41, %v763_v28  ;;  %v873_v11 = vsel %vm1841_vm3, %v870_v22, %v1611_v2 }
  0xa6   : > { %v817_v31 = vsel %vm1385_vm15, %v812_v21, %v766_v17  ;;  %v875_v50 = vsel %vm1413_vm9, %v873_v11, %v1617_v12 }
  0xa7   : > { %v821_v46 = vsel %vm814_vm0, %v817_v31, %v769_v25  ;;  %v878_v61 = vsel %vm832_vm13, %v875_v50, %v1622_v63  ;;  %v1122_v63 = vld [vmem:[%s1785_s2] ss:$0 sm:$0xff] }
  0xa8   : > { %v826_v58 = vsel %vm1397_vm6, %v821_v46, %v772_v53  ;;  %v880_v39 = vsel %vm1449_vm8, %v878_v61, %v1629_v54  ;;  %vm1051_vm6 = vcmask 125952  }
  0xa9   : > { %v830_v9 = vsel %vm1843_vm4, %v826_v58, %v775_v34 }
  0xaa   : > { %v835_v20 = vsel %vm1413_vm9, %v830_v9, %v778_v44 }
  0xab   : > { %v839_v2 = vsel %vm832_vm13, %v835_v20, %v1516_v8  ;;  %v1014_v8 = vld [vmem:[%s1786_s3 + $0x30] sm:$0xff] }
  0xac   : > { %v844_v12 = vsel %vm1449_vm8, %v839_v2, %v1521_v59  ;;  %v1012_v59 = vld [vmem:[%s1786_s3 + $0x20] sm:$0xff] }
  0xad   : > { %1151 = vmatprep.mubr.msk.bf16.mxu0 %vm929_vm2, %v844_v12 }
  0xae   : > { %1152 = vmatmul.mubr.msk.bf16.vlgmr.msra.gmra.mrb[0].mxu0 %vm929_vm2, %v880_v39 }
 0x138   : > { %v1157_v47 = vpop.f32.mrb[0].mxu1 }
 0x139   : > { %v1003_v43 = vadd.f32 %v1157_v47, %v1122_v63  ;;  %v994_v54 = vpop.f32.mrb[1].mxu1 }
 0x13a   : > { %v995_v19 = vadd.f32 %v1122_v63, %v994_v54  ;;  %v1158_v0 = vpop.f32.mrb[2].mxu1 }
 0x13b   : > { %v1021_v51 = vmul.f32 %v1014_v8, %v1003_v43  ;;  %v997_v3 = vpop.f32.mrb[3].mxu1 }
 0x13c   : > { %v1019_v42 = vmul.f32 %v1012_v59, %v995_v19  ;;  %v998_v23 = vadd.f32 %v1122_v63, %v997_v3 }
 0x13d   : > { %v1143_v45 = vpack.c.bf16 %v1021_v51, %v1021_v51 }
 0x13e   : > { %v1141_v4 = vpack.c.bf16 %v1019_v42, %v1019_v42  ;;  %v1020_v1 = vmul.f32 %v1013_v27, %v998_v23 }
 0x13f   : > { %1058 = vst.msk [vmem:[%s1752_s8 + $0x18] sm:$0xf] %vm1051_vm6, %v1143_v45 }
 0x140   : > { %1056 = vst.msk [vmem:[%s1752_s8 + $0x10] sm:$0xf] %vm1051_vm6, %v1141_v4  ;;  %v1142_v7 = vpack.c.bf16 %v1020_v1, %v1020_v1 }
 0x142   : > { %1057 = vst.msk [vmem:[%s1752_s8 + $0x14] sm:$0xf] %vm1051_vm6, %v1142_v7 }
 0x181   : > { %v1153_v57 = vpop.f32.mrb[0].mxu0 }
 0x182   : > { %v987_v44 = vadd.f32 %v1153_v57, %v1122_v63  ;;  %v978_v32 = vpop.f32.mrb[1].mxu0 }
 0x183   : > { %v979_v5 = vadd.f32 %v1122_v63, %v978_v32  ;;  %v1154_v13 = vpop.f32.mrb[2].mxu0 }
 0x184   : > { %v1017_v29 = vmul.f32 %v1010_v56, %v987_v44  ;;  %v990_v10 = vadd.f32 %v1154_v13, %v1122_v63  ;;  %v981_v15 = vpop.f32.mrb[3].mxu0 }
 0x185   : > { %v1015_v49 = vmul.f32 %v1008_v14, %v979_v5  ;;  %v982_v33 = vadd.f32 %v1122_v63, %v981_v15 }
 0x186   : > { %v1139_v26 = vpack.c.bf16 %v1017_v29, %v1017_v29  ;;  %v1018_v62 = vmul.f32 %v1011_v36, %v990_v10 }
 0x187   : > { %v1137_v28 = vpack.c.bf16 %v1015_v49, %v1015_v49  ;;  %v1016_v48 = vmul.f32 %v1009_v35, %v982_v33 }
 0x188   : > { %1054 = vst.msk [vmem:[%s1752_s8 + $0x8] sm:$0xf] %vm1051_vm6, %v1139_v26  ;;  %v1140_v60 = vpack.c.bf16 %v1018_v62, %v1018_v62 }
 0x189   : > { %1052 = vst.msk [vmem:[%s1752_s8] sm:$0xf] %vm1051_vm6, %v1137_v28  ;;  %v1138_v37 = vpack.c.bf16 %v1016_v48, %v1016_v48 }
 0x18a   : > { %1055 = vst.msk [vmem:[%s1752_s8 + $0xc] sm:$0xf] %vm1051_vm6, %v1140_v60 }
 0x18b   : > { %1053 = vst.msk [vmem:[%s1752_s8 + $0x4] sm:$0xf] %vm1051_vm6, %v1138_v37 }
 0x18c PF: > { %s14_s15 = sadd.s32 1, %s1178_s15  }
 0x18d   : > { %p11_p4 = scmp.ge.s32.totalorder %s14_s15, 4  }
 0x18f   :  { %13 = sbr.rel (!%p11_p4) target bundleno = 1 (0x1), region = 66 }

</bundles_post_ra>
